<compile_context>
chip_gen: v5e
topology: v5e:2x2
jax: 0.10.0
libtpu: 0.0.40
codegen_flags: <defaults>
</compile_context>

<pallas_src>
import jax
import jax.numpy as jnp
import numpy as np
from jax.experimental import pallas as pl
from jax.experimental.pallas import tpu as pltpu


# ----------------------------- Pallas kernels ------------------------------

def _conv_pool_kernel(p_ref, w_ref, b_ref, o_ref):
    """o = relu(max_q(W @ P[q]) + b) -- fused conv-GEMM + bias + ReLU + 2x2 pool.

    p_ref: [4, Kf, tm] bf16 (stacked pool-parity patch matrices)
    w_ref: [OC, Kf]    bf16
    b_ref: [OC, 1]     f32
    o_ref: [OC, tm]    bf16
    """
    w = w_ref[...]
    y = jnp.dot(w, p_ref[0], preferred_element_type=jnp.float32)
    y = jnp.maximum(y, jnp.dot(w, p_ref[1], preferred_element_type=jnp.float32))
    y = jnp.maximum(y, jnp.dot(w, p_ref[2], preferred_element_type=jnp.float32))
    y = jnp.maximum(y, jnp.dot(w, p_ref[3], preferred_element_type=jnp.float32))
    y = y + b_ref[...]                                  # f32 bias, lane-broadcast
    o_ref[...] = jnp.maximum(y, 0.0).astype(o_ref.dtype)


def _mlp_kernel(x_ref, w1_ref, b1_ref, w2_ref, b2_ref, w3_ref, b3_ref, o_ref):
    """Fused fc1+relu -> fc2+relu -> fc3, transposed (batch on lanes).

    x_ref: [400, tb] bf16;  w*: bf16 (padded to 128 hidden);  b*: f32 columns.
    o_ref: [10, tb] f32.
    """
    h = jnp.dot(w1_ref[...], x_ref[...], preferred_element_type=jnp.float32) + b1_ref[...]
    h = jnp.maximum(h, 0.0).astype(w2_ref.dtype)
    h = jnp.dot(w2_ref[...], h, preferred_element_type=jnp.float32) + b2_ref[...]
    h = jnp.maximum(h, 0.0).astype(w3_ref.dtype)
    o = jnp.dot(w3_ref[...], h, preferred_element_type=jnp.float32) + b3_ref[...]
    o_ref[...] = o.astype(o_ref.dtype)


# ------------------------------ wrappers ------------------------------------

_VMEM_LIMIT = 32 * 1024 * 1024  # explicit scoped-VMEM budget (safe on v5e/v6e/v7x)


def _choose_tile(n, candidates=(4096, 2048, 1024, 512, 256, 128)):
    """Largest lane-aligned candidate dividing n, preferring >=2 grid steps
    (v7x megacore). Falls back to a single full block if nothing divides."""
    divisors = [c for c in candidates if n % c == 0]
    if not divisors:
        return n
    multi = [c for c in divisors if n // c >= 2]
    return multi[0] if multi else divisors[0]


def _pool_parity_patches(x_chwb, K, ph, pw):
    """x_chwb:[C,H,W,B] -> patch matrix [C*K*K, OHp*OWp*B] holding only the
    conv-output pixels with (oh%2, ow%2) == (ph, pw).  Rows flattened in
    (c, kh, kw) order (torch Conv2d weight order); columns in (ohp, owp, b)
    order with batch innermost (lane axis)."""
    C, H, W, B = x_chwb.shape
    OH, OW = H - K + 1, W - K + 1
    OHp, OWp = OH // 2, OW // 2
    cols = []
    for kh in range(K):
        for kw in range(K):
            h0, w0 = ph + kh, pw + kw
            cols.append(x_chwb[:, h0:h0 + 2 * OHp - 1:2, w0:w0 + 2 * OWp - 1:2, :])
    p = jnp.stack(cols, axis=1)                       # [C, K*K, OHp, OWp, B]
    return p.reshape(C * K * K, OHp * OWp * B)


def conv_relu_pool(x_chwb, w_mat, bias_col, K=5):
    """Fused Conv2d(valid, stride 1) + ReLU + MaxPool2d(2,2).
    x_chwb: [C,H,W,B] bf16; w_mat: [OC, C*K*K] bf16; bias_col: [OC,1] f32.
    Returns [OC, OHp, OWp, B] bf16."""
    C, H, W, B = x_chwb.shape
    OC = w_mat.shape[0]
    OH, OW = H - K + 1, W - K + 1
    assert OH % 2 == 0 and OW % 2 == 0, "parity-pool fusion needs even conv output dims"
    OHp, OWp = OH // 2, OW // 2
    Mp = OHp * OWp * B
    Kf = C * K * K

    # TODO(synk): build these inside the kernel with strided pl.ds reads to
    # kill the K^2 HBM inflation (see header note).
    patches = jnp.stack(
        [_pool_parity_patches(x_chwb, K, ph, pw) for ph in (0, 1) for pw in (0, 1)],
        axis=0)                                       # [4, Kf, Mp] bf16

    tm = _choose_tile(Mp)
    grid = (Mp // tm,)

    out = pl.pallas_call(
        _conv_pool_kernel,
        out_shape=jax.ShapeDtypeStruct((OC, Mp), jnp.bfloat16),
        grid=grid,
        in_specs=[pl.BlockSpec((4, Kf, tm), lambda i: (0, 0, i)),
                  pl.BlockSpec((OC, Kf), lambda i: (0, 0)),
                  pl.BlockSpec((OC, 1), lambda i: (0, 0))],
        out_specs=pl.BlockSpec((OC, tm), lambda i: (0, i)),
        compiler_params=pltpu.CompilerParams(
            dimension_semantics=("parallel",),
            vmem_limit_bytes=_VMEM_LIMIT),
    )(patches, w_mat, bias_col)
    return out.reshape(OC, OHp, OWp, B)               # contiguous (free) reshape


def mlp_fused(xf, w1, b1, w2, b2, w3, b3):
    """xf:[400,B] bf16 -> fused relu(W1@xf+b1) -> relu(W2@.+b2) -> W3@.+b3.
    Returns [10, B] f32 (batch on lanes)."""
    D, B = xf.shape
    NO = w3.shape[0]
    tb = _choose_tile(B, candidates=(512, 256, 128))
    grid = (B // tb,)

    def full(a):
        return pl.BlockSpec(a.shape, lambda i: (0, 0))

    return pl.pallas_call(
        _mlp_kernel,
        out_shape=jax.ShapeDtypeStruct((NO, B), jnp.float32),
        grid=grid,
        in_specs=[pl.BlockSpec((D, tb), lambda i: (0, i)),
                  full(w1), full(b1), full(w2), full(b2), full(w3), full(b3)],
        out_specs=pl.BlockSpec((NO, tb), lambda i: (0, i)),
        compiler_params=pltpu.CompilerParams(
            dimension_semantics=("parallel",),
            vmem_limit_bytes=_VMEM_LIMIT),
    )(xf, w1, b1, w2, b2, w3, b3)


# ----------------------------- model definition -----------------------------

def init_params(key):
    ks = jax.random.split(key, 10)

    def u(k, shape, scale):
        return jax.random.uniform(k, shape, jnp.float32, -1.0, 1.0) * scale

    return {
        "conv1_w": u(ks[0], (6, 3, 5, 5), 0.1),
        "conv1_b": u(ks[1], (6,), 0.1),
        "conv2_w": u(ks[2], (16, 6, 5, 5), 0.1),
        "conv2_b": u(ks[3], (16,), 0.1),
        "fc1_w": u(ks[4], (120, 400), 0.05),   # torch Linear layout [out, in]
        "fc1_b": u(ks[5], (120,), 0.05),
        "fc2_w": u(ks[6], (84, 120), 0.05),
        "fc2_b": u(ks[7], (84,), 0.05),
        "fc3_w": u(ks[8], (10, 84), 0.05),
        "fc3_b": u(ks[9], (10,), 0.05),
    }


def prepare_params(params):
    """One-time layout prep: conv weight flatten, bf16 casts, FC padding to
    128-lane hidden widths, bias column reshapes. Hoisted out of forward."""
    def pad_to(a, shape):
        return jnp.pad(a, [(0, s - d) for d, s in zip(a.shape, shape)])

    H1, H2 = 128, 128   # fc1 (120) / fc2 (84) widths padded to the lane boundary
    return {
        "conv1_w": params["conv1_w"].reshape(6, -1).astype(jnp.bfloat16),     # [6, 75]
        "conv1_b": params["conv1_b"].reshape(-1, 1).astype(jnp.float32),
        "conv2_w": params["conv2_w"].reshape(16, -1).astype(jnp.bfloat16),    # [16, 150]
        "conv2_b": params["conv2_b"].reshape(-1, 1).astype(jnp.float32),
        "fc1_w": pad_to(params["fc1_w"], (H1, 400)).astype(jnp.bfloat16),     # [128, 400]
        "fc1_b": pad_to(params["fc1_b"], (H1,)).reshape(H1, 1).astype(jnp.float32),
        "fc2_w": pad_to(params["fc2_w"], (H2, H1)).astype(jnp.bfloat16),      # [128, 128]
        "fc2_b": pad_to(params["fc2_b"], (H2,)).reshape(H2, 1).astype(jnp.float32),
        "fc3_w": pad_to(params["fc3_w"], (10, H2)).astype(jnp.bfloat16),      # [10, 128]
        "fc3_b": params["fc3_b"].reshape(10, 1).astype(jnp.float32),
    }


def lenet5_forward(pp, x):
    # x: [B, 3, 32, 32] float32 (NCHW, same as the PyTorch module)
    B = x.shape[0]
    x_chwb = jnp.transpose(x, (1, 2, 3, 0)).astype(jnp.bfloat16)    # [3,32,32,B]
    y1 = conv_relu_pool(x_chwb, pp["conv1_w"], pp["conv1_b"])       # [6,14,14,B]
    y2 = conv_relu_pool(y1, pp["conv2_w"], pp["conv2_b"])           # [16,5,5,B]
    # torch .view(B,-1) flattens (c,h,w) per sample; with batch innermost this
    # is a contiguous reshape to the transposed MLP input [400, B].
    xf = y2.reshape(16 * 5 * 5, B)
    logits_t = mlp_fused(xf, pp["fc1_w"], pp["fc1_b"],
                         pp["fc2_w"], pp["fc2_b"],
                         pp["fc3_w"], pp["fc3_b"])                  # [10, B]
    return logits_t.T                                               # [B, 10]


# pure-JAX f32 reference for a sanity check
def lenet5_reference(params, x):
    dn = ("NCHW", "OIHW", "NCHW")
    y = jax.lax.conv_general_dilated(x, params["conv1_w"], (1, 1), "VALID",
                                     dimension_numbers=dn)
    y = jax.nn.relu(y + params["conv1_b"][None, :, None, None])
    y = jax.lax.reduce_window(y, -jnp.inf, jax.lax.max, (1, 1, 2, 2), (1, 1, 2, 2), "VALID")
    y = jax.lax.conv_general_dilated(y, params["conv2_w"], (1, 1), "VALID",
                                     dimension_numbers=dn)
    y = jax.nn.relu(y + params["conv2_b"][None, :, None, None])
    y = jax.lax.reduce_window(y, -jnp.inf, jax.lax.max, (1, 1, 2, 2), (1, 1, 2, 2), "VALID")
    y = y.reshape(y.shape[0], -1)
    y = jax.nn.relu(y @ params["fc1_w"].T + params["fc1_b"])
    y = jax.nn.relu(y @ params["fc2_w"].T + params["fc2_b"])
    y = y @ params["fc3_w"].T + params["fc3_b"]
    return y


if __name__ == "__main__":
    key = jax.random.PRNGKey(0)
    kx, kp = jax.random.split(key)
    # LeNet-5 requires 3x32x32 input so the flatten is exactly 16*5*5 = 400.
    x = jax.random.normal(kx, (2, 3, 32, 32), jnp.float32)
    params = init_params(kp)
    pp = prepare_params(params)

    fwd = jax.jit(lenet5_forward)
    out = jax.block_until_ready(fwd(pp, x))
    assert out.shape == (2, 10), out.shape

    ref = lenet5_reference(params, x)
    # bf16 matmul operands with f32 accumulation: loosened atol vs pure-f32.
    np.testing.assert_allclose(np.asarray(out), np.asarray(ref), rtol=5e-2, atol=2e-2)

    print("KERNEL_OK")
</pallas_src>

<mosaic_0001>
module attributes {stable_mosaic.version = 11 : i64} {
  func.func @_conv_pool_kernel(%arg0: i32, %arg1: memref<4x75x392xbf16, #tpu.memory_space<vmem>>, %arg2: memref<6x75xbf16, #tpu.memory_space<vmem>>, %arg3: memref<6x1xf32, #tpu.memory_space<vmem>>, %arg4: memref<6x392xbf16, #tpu.memory_space<vmem>>) attributes {dimension_semantics = [#tpu.dimension_semantics<parallel>], iteration_bounds = array<i64: 1>, scalar_prefetch = 0 : i64, scratch_operands = 0 : i64, tpu.core_type = #tpu.core_type<tc>, window_params = [{transform_indices = @transform_0, window_bounds = array<i64: 4, 75, 392>}, {pipeline_mode = #tpu.pipeline_mode<synchronous>, transform_indices = @transform_1, window_bounds = array<i64: 6, 75>}, {pipeline_mode = #tpu.pipeline_mode<synchronous>, transform_indices = @transform_2, window_bounds = array<i64: 6, 1>}, {transform_indices = @transform_3, window_bounds = array<i64: 6, 392>}]} {
    %c0 = arith.constant 0 : index
    %c0_0 = arith.constant 0 : index
    %0 = vector.load %arg2[%c0, %c0_0] : memref<6x75xbf16, #tpu.memory_space<vmem>>, vector<6x75xbf16>
    %c0_1 = arith.constant 0 : index
    %c0_2 = arith.constant 0 : index
    %c0_3 = arith.constant 0 : index
    %1 = vector.load %arg1[%c0_1, %c0_2, %c0_3] : memref<4x75x392xbf16, #tpu.memory_space<vmem>>, vector<1x75x392xbf16>
    %2 = vector.shape_cast %1 : vector<1x75x392xbf16> to vector<75x392xbf16>
    %cst = arith.constant dense<0.000000e+00> : vector<6x392xf32>
    %3 = tpu.matmul %0, %2, %cst {dimension_numbers = #tpu.dot_dimension_numbers<[1], [0], [0], [1], [0, 0, 1, 1], [], []>} : vector<6x75xbf16>, vector<75x392xbf16>, vector<6x392xf32> -> vector<6x392xf32>
    %c1 = arith.constant 1 : index
    %c0_4 = arith.constant 0 : index
    %c0_5 = arith.constant 0 : index
    %4 = vector.load %arg1[%c1, %c0_4, %c0_5] : memref<4x75x392xbf16, #tpu.memory_space<vmem>>, vector<1x75x392xbf16>
    %5 = vector.shape_cast %4 : vector<1x75x392xbf16> to vector<75x392xbf16>
    %cst_6 = arith.constant dense<0.000000e+00> : vector<6x392xf32>
    %6 = tpu.matmul %0, %5, %cst_6 {dimension_numbers = #tpu.dot_dimension_numbers<[1], [0], [0], [1], [0, 0, 1, 1], [], []>} : vector<6x75xbf16>, vector<75x392xbf16>, vector<6x392xf32> -> vector<6x392xf32>
    %7 = arith.maximumf %3, %6 : vector<6x392xf32>
    %c2 = arith.constant 2 : index
    %c0_7 = arith.constant 0 : index
    %c0_8 = arith.constant 0 : index
    %8 = vector.load %arg1[%c2, %c0_7, %c0_8] : memref<4x75x392xbf16, #tpu.memory_space<vmem>>, vector<1x75x392xbf16>
    %9 = vector.shape_cast %8 : vector<1x75x392xbf16> to vector<75x392xbf16>
    %cst_9 = arith.constant dense<0.000000e+00> : vector<6x392xf32>
    %10 = tpu.matmul %0, %9, %cst_9 {dimension_numbers = #tpu.dot_dimension_numbers<[1], [0], [0], [1], [0, 0, 1, 1], [], []>} : vector<6x75xbf16>, vector<75x392xbf16>, vector<6x392xf32> -> vector<6x392xf32>
    %11 = arith.maximumf %7, %10 : vector<6x392xf32>
    %c3 = arith.constant 3 : index
    %c0_10 = arith.constant 0 : index
    %c0_11 = arith.constant 0 : index
    %12 = vector.load %arg1[%c3, %c0_10, %c0_11] : memref<4x75x392xbf16, #tpu.memory_space<vmem>>, vector<1x75x392xbf16>
    %13 = vector.shape_cast %12 : vector<1x75x392xbf16> to vector<75x392xbf16>
    %cst_12 = arith.constant dense<0.000000e+00> : vector<6x392xf32>
    %14 = tpu.matmul %0, %13, %cst_12 {dimension_numbers = #tpu.dot_dimension_numbers<[1], [0], [0], [1], [0, 0, 1, 1], [], []>} : vector<6x75xbf16>, vector<75x392xbf16>, vector<6x392xf32> -> vector<6x392xf32>
    %15 = arith.maximumf %11, %14 : vector<6x392xf32>
    %c0_13 = arith.constant 0 : index
    %c0_14 = arith.constant 0 : index
    %16 = vector.load %arg3[%c0_13, %c0_14] : memref<6x1xf32, #tpu.memory_space<vmem>>, vector<6x1xf32>
    %17 = vector.broadcast %16 : vector<6x1xf32> to vector<6x392xf32>
    %18 = arith.addf %15, %17 : vector<6x392xf32>
    %cst_15 = arith.constant 0.000000e+00 : f32
    %19 = vector.broadcast %cst_15 : f32 to vector<6x392xf32>
    %20 = arith.maximumf %18, %19 : vector<6x392xf32>
    %21 = arith.truncf %20 : vector<6x392xf32> to vector<6x392xbf16>
    %c0_16 = arith.constant 0 : index
    %c0_17 = arith.constant 0 : index
    %22 = vector.load %arg4[%c0_16, %c0_17] : memref<6x392xbf16, #tpu.memory_space<vmem>>, vector<6x392xbf16>
    tpu.vector_store %arg4[%c0_16, %c0_17], %21 {strides = array<i32>} : memref<6x392xbf16, #tpu.memory_space<vmem>>, vector<6x392xbf16>,
    return
  }
  func.func @transform_0(%arg0: i32) -> (i32, i32, i32) {
    %c0_i32 = arith.constant 0 : i32
    %c0_i32_0 = arith.constant 0 : i32
    %c0_i32_1 = arith.constant 0 : i32
    return %c0_i32, %c0_i32_0, %arg0 : i32, i32, i32
  }
  func.func @transform_1(%arg0: i32) -> (i32, i32) {
    %c0_i32 = arith.constant 0 : i32
    %c0_i32_0 = arith.constant 0 : i32
    %c0_i32_1 = arith.constant 0 : i32
    return %c0_i32, %c0_i32_0 : i32, i32
  }
  func.func @transform_2(%arg0: i32) -> (i32, i32) {
    %c0_i32 = arith.constant 0 : i32
    %c0_i32_0 = arith.constant 0 : i32
    %c0_i32_1 = arith.constant 0 : i32
    return %c0_i32, %c0_i32_0 : i32, i32
  }
  func.func @transform_3(%arg0: i32) -> (i32, i32) {
    %c0_i32 = arith.constant 0 : i32
    %c0_i32_0 = arith.constant 0 : i32
    return %c0_i32, %arg0 : i32, i32
  }
}

module attributes {stable_mosaic.version = 11 : i64} {
  func.func @_conv_pool_kernel(%arg0: i32, %arg1: memref<4x150x50xbf16, #tpu.memory_space<vmem>>, %arg2: memref<16x150xbf16, #tpu.memory_space<vmem>>, %arg3: memref<16x1xf32, #tpu.memory_space<vmem>>, %arg4: memref<16x50xbf16, #tpu.memory_space<vmem>>) attributes {dimension_semantics = [#tpu.dimension_semantics<parallel>], iteration_bounds = array<i64: 1>, scalar_prefetch = 0 : i64, scratch_operands = 0 : i64, tpu.core_type = #tpu.core_type<tc>, window_params = [{transform_indices = @transform_0, window_bounds = array<i64: 4, 150, 50>}, {pipeline_mode = #tpu.pipeline_mode<synchronous>, transform_indices = @transform_1, window_bounds = array<i64: 16, 150>}, {pipeline_mode = #tpu.pipeline_mode<synchronous>, transform_indices = @transform_2, window_bounds = array<i64: 16, 1>}, {transform_indices = @transform_3, window_bounds = array<i64: 16, 50>}]} {
    %c0 = arith.constant 0 : index
    %c0_0 = arith.constant 0 : index
    %0 = vector.load %arg2[%c0, %c0_0] : memref<16x150xbf16, #tpu.memory_space<vmem>>, vector<16x150xbf16>
    %c0_1 = arith.constant 0 : index
    %c0_2 = arith.constant 0 : index
    %c0_3 = arith.constant 0 : index
    %1 = vector.load %arg1[%c0_1, %c0_2, %c0_3] : memref<4x150x50xbf16, #tpu.memory_space<vmem>>, vector<1x150x50xbf16>
    %2 = vector.shape_cast %1 : vector<1x150x50xbf16> to vector<150x50xbf16>
    %cst = arith.constant dense<0.000000e+00> : vector<16x50xf32>
    %3 = tpu.matmul %0, %2, %cst {dimension_numbers = #tpu.dot_dimension_numbers<[1], [0], [0], [1], [0, 0, 1, 1], [], []>} : vector<16x150xbf16>, vector<150x50xbf16>, vector<16x50xf32> -> vector<16x50xf32>
    %c1 = arith.constant 1 : index
    %c0_4 = arith.constant 0 : index
    %c0_5 = arith.constant 0 : index
    %4 = vector.load %arg1[%c1, %c0_4, %c0_5] : memref<4x150x50xbf16, #tpu.memory_space<vmem>>, vector<1x150x50xbf16>
    %5 = vector.shape_cast %4 : vector<1x150x50xbf16> to vector<150x50xbf16>
    %cst_6 = arith.constant dense<0.000000e+00> : vector<16x50xf32>
    %6 = tpu.matmul %0, %5, %cst_6 {dimension_numbers = #tpu.dot_dimension_numbers<[1], [0], [0], [1], [0, 0, 1, 1], [], []>} : vector<16x150xbf16>, vector<150x50xbf16>, vector<16x50xf32> -> vector<16x50xf32>
    %7 = arith.maximumf %3, %6 : vector<16x50xf32>
    %c2 = arith.constant 2 : index
    %c0_7 = arith.constant 0 : index
    %c0_8 = arith.constant 0 : index
    %8 = vector.load %arg1[%c2, %c0_7, %c0_8] : memref<4x150x50xbf16, #tpu.memory_space<vmem>>, vector<1x150x50xbf16>
    %9 = vector.shape_cast %8 : vector<1x150x50xbf16> to vector<150x50xbf16>
    %cst_9 = arith.constant dense<0.000000e+00> : vector<16x50xf32>
    %10 = tpu.matmul %0, %9, %cst_9 {dimension_numbers = #tpu.dot_dimension_numbers<[1], [0], [0], [1], [0, 0, 1, 1], [], []>} : vector<16x150xbf16>, vector<150x50xbf16>, vector<16x50xf32> -> vector<16x50xf32>
    %11 = arith.maximumf %7, %10 : vector<16x50xf32>
    %c3 = arith.constant 3 : index
    %c0_10 = arith.constant 0 : index
    %c0_11 = arith.constant 0 : index
    %12 = vector.load %arg1[%c3, %c0_10, %c0_11] : memref<4x150x50xbf16, #tpu.memory_space<vmem>>, vector<1x150x50xbf16>
    %13 = vector.shape_cast %12 : vector<1x150x50xbf16> to vector<150x50xbf16>
    %cst_12 = arith.constant dense<0.000000e+00> : vector<16x50xf32>
    %14 = tpu.matmul %0, %13, %cst_12 {dimension_numbers = #tpu.dot_dimension_numbers<[1], [0], [0], [1], [0, 0, 1, 1], [], []>} : vector<16x150xbf16>, vector<150x50xbf16>, vector<16x50xf32> -> vector<16x50xf32>
    %15 = arith.maximumf %11, %14 : vector<16x50xf32>
    %c0_13 = arith.constant 0 : index
    %c0_14 = arith.constant 0 : index
    %16 = vector.load %arg3[%c0_13, %c0_14] : memref<16x1xf32, #tpu.memory_space<vmem>>, vector<16x1xf32>
    %17 = vector.broadcast %16 : vector<16x1xf32> to vector<16x50xf32>
    %18 = arith.addf %15, %17 : vector<16x50xf32>
    %cst_15 = arith.constant 0.000000e+00 : f32
    %19 = vector.broadcast %cst_15 : f32 to vector<16x50xf32>
    %20 = arith.maximumf %18, %19 : vector<16x50xf32>
    %21 = arith.truncf %20 : vector<16x50xf32> to vector<16x50xbf16>
    %c0_16 = arith.constant 0 : index
    %c0_17 = arith.constant 0 : index
    %22 = vector.load %arg4[%c0_16, %c0_17] : memref<16x50xbf16, #tpu.memory_space<vmem>>, vector<16x50xbf16>
    tpu.vector_store %arg4[%c0_16, %c0_17], %21 {strides = array<i32>} : memref<16x50xbf16, #tpu.memory_space<vmem>>, vector<16x50xbf16>,
    return
  }
  func.func @transform_0(%arg0: i32) -> (i32, i32, i32) {
    %c0_i32 = arith.constant 0 : i32
    %c0_i32_0 = arith.constant 0 : i32
    %c0_i32_1 = arith.constant 0 : i32
    return %c0_i32, %c0_i32_0, %arg0 : i32, i32, i32
  }
  func.func @transform_1(%arg0: i32) -> (i32, i32) {
    %c0_i32 = arith.constant 0 : i32
    %c0_i32_0 = arith.constant 0 : i32
    %c0_i32_1 = arith.constant 0 : i32
    return %c0_i32, %c0_i32_0 : i32, i32
  }
  func.func @transform_2(%arg0: i32) -> (i32, i32) {
    %c0_i32 = arith.constant 0 : i32
    %c0_i32_0 = arith.constant 0 : i32
    %c0_i32_1 = arith.constant 0 : i32
    return %c0_i32, %c0_i32_0 : i32, i32
  }
  func.func @transform_3(%arg0: i32) -> (i32, i32) {
    %c0_i32 = arith.constant 0 : i32
    %c0_i32_0 = arith.constant 0 : i32
    return %c0_i32, %arg0 : i32, i32
  }
}

module attributes {stable_mosaic.version = 11 : i64} {
  func.func @_mlp_kernel(%arg0: i32, %arg1: memref<400x2xbf16, #tpu.memory_space<vmem>>, %arg2: memref<128x400xbf16, #tpu.memory_space<vmem>>, %arg3: memref<128x1xf32, #tpu.memory_space<vmem>>, %arg4: memref<128x128xbf16, #tpu.memory_space<vmem>>, %arg5: memref<128x1xf32, #tpu.memory_space<vmem>>, %arg6: memref<10x128xbf16, #tpu.memory_space<vmem>>, %arg7: memref<10x1xf32, #tpu.memory_space<vmem>>, %arg8: memref<10x2xf32, #tpu.memory_space<vmem>>) attributes {dimension_semantics = [#tpu.dimension_semantics<parallel>], iteration_bounds = array<i64: 1>, scalar_prefetch = 0 : i64, scratch_operands = 0 : i64, tpu.core_type = #tpu.core_type<tc>, window_params = [{transform_indices = @transform_0, window_bounds = array<i64: 400, 2>}, {pipeline_mode = #tpu.pipeline_mode<synchronous>, transform_indices = @transform_1, window_bounds = array<i64: 128, 400>}, {pipeline_mode = #tpu.pipeline_mode<synchronous>, transform_indices = @transform_2, window_bounds = array<i64: 128, 1>}, {pipeline_mode = #tpu.pipeline_mode<synchronous>, transform_indices = @transform_3, window_bounds = array<i64: 128, 128>}, {pipeline_mode = #tpu.pipeline_mode<synchronous>, transform_indices = @transform_4, window_bounds = array<i64: 128, 1>}, {pipeline_mode = #tpu.pipeline_mode<synchronous>, transform_indices = @transform_5, window_bounds = array<i64: 10, 128>}, {pipeline_mode = #tpu.pipeline_mode<synchronous>, transform_indices = @transform_6, window_bounds = array<i64: 10, 1>}, {transform_indices = @transform_7, window_bounds = array<i64: 10, 2>}]} {
    %c0 = arith.constant 0 : index
    %c0_0 = arith.constant 0 : index
    %0 = vector.load %arg2[%c0, %c0_0] : memref<128x400xbf16, #tpu.memory_space<vmem>>, vector<128x400xbf16>
    %c0_1 = arith.constant 0 : index
    %c0_2 = arith.constant 0 : index
    %1 = vector.load %arg1[%c0_1, %c0_2] : memref<400x2xbf16, #tpu.memory_space<vmem>>, vector<400x2xbf16>
    %cst = arith.constant dense<0.000000e+00> : vector<128x2xf32>
    %2 = tpu.matmul %0, %1, %cst {dimension_numbers = #tpu.dot_dimension_numbers<[1], [0], [0], [1], [0, 0, 1, 1], [], []>} : vector<128x400xbf16>, vector<400x2xbf16>, vector<128x2xf32> -> vector<128x2xf32>
    %c0_3 = arith.constant 0 : index
    %c0_4 = arith.constant 0 : index
    %3 = vector.load %arg3[%c0_3, %c0_4] : memref<128x1xf32, #tpu.memory_space<vmem>>, vector<128x1xf32>
    %4 = vector.broadcast %3 : vector<128x1xf32> to vector<128x2xf32>
    %5 = arith.addf %2, %4 : vector<128x2xf32>
    %cst_5 = arith.constant 0.000000e+00 : f32
    %6 = vector.broadcast %cst_5 : f32 to vector<128x2xf32>
    %7 = arith.maximumf %5, %6 : vector<128x2xf32>
    %8 = arith.truncf %7 : vector<128x2xf32> to vector<128x2xbf16>
    %c0_6 = arith.constant 0 : index
    %c0_7 = arith.constant 0 : index
    %9 = vector.load %arg4[%c0_6, %c0_7] : memref<128x128xbf16, #tpu.memory_space<vmem>>, vector<128x128xbf16>
    %cst_8 = arith.constant dense<0.000000e+00> : vector<128x2xf32>
    %10 = tpu.matmul %9, %8, %cst_8 {dimension_numbers = #tpu.dot_dimension_numbers<[1], [0], [0], [1], [0, 0, 1, 1], [], []>} : vector<128x128xbf16>, vector<128x2xbf16>, vector<128x2xf32> -> vector<128x2xf32>
    %c0_9 = arith.constant 0 : index
    %c0_10 = arith.constant 0 : index
    %11 = vector.load %arg5[%c0_9, %c0_10] : memref<128x1xf32, #tpu.memory_space<vmem>>, vector<128x1xf32>
    %12 = vector.broadcast %11 : vector<128x1xf32> to vector<128x2xf32>
    %13 = arith.addf %10, %12 : vector<128x2xf32>
    %cst_11 = arith.constant 0.000000e+00 : f32
    %14 = vector.broadcast %cst_11 : f32 to vector<128x2xf32>
    %15 = arith.maximumf %13, %14 : vector<128x2xf32>
    %16 = arith.truncf %15 : vector<128x2xf32> to vector<128x2xbf16>
    %c0_12 = arith.constant 0 : index
    %c0_13 = arith.constant 0 : index
    %17 = vector.load %arg6[%c0_12, %c0_13] : memref<10x128xbf16, #tpu.memory_space<vmem>>, vector<10x128xbf16>
    %cst_14 = arith.constant dense<0.000000e+00> : vector<10x2xf32>
    %18 = tpu.matmul %17, %16, %cst_14 {dimension_numbers = #tpu.dot_dimension_numbers<[1], [0], [0], [1], [0, 0, 1, 1], [], []>} : vector<10x128xbf16>, vector<128x2xbf16>, vector<10x2xf32> -> vector<10x2xf32>
    %c0_15 = arith.constant 0 : index
    %c0_16 = arith.constant 0 : index
    %19 = vector.load %arg7[%c0_15, %c0_16] : memref<10x1xf32, #tpu.memory_space<vmem>>, vector<10x1xf32>
    %20 = vector.broadcast %19 : vector<10x1xf32> to vector<10x2xf32>
    %21 = arith.addf %18, %20 : vector<10x2xf32>
    %c0_17 = arith.constant 0 : index
    %c0_18 = arith.constant 0 : index
    %22 = vector.load %arg8[%c0_17, %c0_18] : memref<10x2xf32, #tpu.memory_space<vmem>>, vector<10x2xf32>
    tpu.vector_store %arg8[%c0_17, %c0_18], %21 {strides = array<i32>} : memref<10x2xf32, #tpu.memory_space<vmem>>, vector<10x2xf32>,
    return
  }
  func.func @transform_0(%arg0: i32) -> (i32, i32) {
    %c0_i32 = arith.constant 0 : i32
    %c0_i32_0 = arith.constant 0 : i32
    return %c0_i32, %arg0 : i32, i32
  }
  func.func @transform_1(%arg0: i32) -> (i32, i32) {
    %c0_i32 = arith.constant 0 : i32
    %c0_i32_0 = arith.constant 0 : i32
    %c0_i32_1 = arith.constant 0 : i32
    return %c0_i32, %c0_i32_0 : i32, i32
  }
  func.func @transform_2(%arg0: i32) -> (i32, i32) {
    %c0_i32 = arith.constant 0 : i32
    %c0_i32_0 = arith.constant 0 : i32
    %c0_i32_1 = arith.constant 0 : i32
    return %c0_i32, %c0_i32_0 : i32, i32
  }
  func.func @transform_3(%arg0: i32) -> (i32, i32) {
    %c0_i32 = arith.constant 0 : i32
    %c0_i32_0 = arith.constant 0 : i32
    %c0_i32_1 = arith.constant 0 : i32
    return %c0_i32, %c0_i32_0 : i32, i32
  }
  func.func @transform_4(%arg0: i32) -> (i32, i32) {
    %c0_i32 = arith.constant 0 : i32
    %c0_i32_0 = arith.constant 0 : i32
    %c0_i32_1 = arith.constant 0 : i32
    return %c0_i32, %c0_i32_0 : i32, i32
  }
  func.func @transform_5(%arg0: i32) -> (i32, i32) {
    %c0_i32 = arith.constant 0 : i32
    %c0_i32_0 = arith.constant 0 : i32
    %c0_i32_1 = arith.constant 0 : i32
    return %c0_i32, %c0_i32_0 : i32, i32
  }
  func.func @transform_6(%arg0: i32) -> (i32, i32) {
    %c0_i32 = arith.constant 0 : i32
    %c0_i32_0 = arith.constant 0 : i32
    %c0_i32_1 = arith.constant 0 : i32
    return %c0_i32, %c0_i32_0 : i32, i32
  }
  func.func @transform_7(%arg0: i32) -> (i32, i32) {
    %c0_i32 = arith.constant 0 : i32
    %c0_i32_0 = arith.constant 0 : i32
    return %c0_i32, %arg0 : i32, i32
  }
}

</mosaic_0001>

<bundles_post_ra>
// kernel: lenet5_forward.3
= control target key start
LH: loop header
LB: loop body
LE: loop exit
PB: predicated region body
PF: predicated region fallthrough
CT: control target
= control target key end

     0   :  { %vm136_vm0 = vcmask 1044480   ;;  %vm137_vm1 = vcmask 1045504   ;;  %v1263_v2 = vmov 65535   ;;  %vm132_vm2 = vcmask 613376   ;;  %s1829_s0 = inlined_call_operand.vmem [shape: bf16[4,75,392], index: 0, kind: input, shape index: {}]   ;;  %s1830_s1 = inlined_call_operand.vmem [shape: bf16[6,75], index: 1, kind: input, shape index: {}]   ;;  %s1831_s2 = inlined_call_operand.vmem [shape: f32[6,1], index: 2, kind: input, shape index: {}]   ;;  %s1832_s3 = inlined_call_operand.vmem [shape: bf16[6,392], index: 3, kind: output, shape index: {}]  }
   0x1   :  { %v850_v0 = vld [vmem:[%s1829_s0 + $0x80] sm:$0xf]  ;;  %v1198_v1 = vld [vmem:[%s1829_s0 + $0x8c] sm:$0x30]  ;;  %v138_v3 = vsel %vm136_vm0, 4294967295, %v1263_v2  ;;  %vm776_vm3 = vcmask 1042432  }
   0x2   :  { %v851_v4 = vor.u32 %v1198_v1, %v850_v0  ;;  %v1291_v5 = vsel %vm137_vm1, %v138_v3, 0  ;;  %v1196_v6 = vld [vmem:[%s1829_s0 + $0x84] sm:$0xf]  ;;  %v852_v7 = vld [vmem:[%s1829_s0 + $0x90] sm:$0x30]  ;;  %vm777_vm4 = vcmask 63492  }
   0x3   :  { %v855_v8 = vor.u32 %v1196_v6, %v852_v7  ;;  %v858_v9 = vld [vmem:[%s1829_s0 + $0x88] sm:$0xf]  ;;  %v1199_v10 = vld [vmem:[%s1829_s0 + $0x94] sm:$0x30]  ;;  %v1197_v11 = vld [vmem:[%s1829_s0 + $0x8c] sm:$0xf] }
   0x4   :  { %v141_v12 = vand.u32 %v851_v4, %v1291_v5  ;;  %v859_v13 = vor.u32 %v1199_v10, %v858_v9  ;;  %v860_v14 = vld [vmem:[%s1829_s0 + $0x98] sm:$0x30]  ;;  %v834_v15 = vld [vmem:[%s1829_s0 + $0x60] sm:$0xf]  ;;  %v1194_v16 = vld [vmem:[%s1829_s0 + $0x6c] sm:$0xf0] }
   0x5   :  { %v144_v17 = vand.u32 %v855_v8, %v1291_v5  ;;  %v863_v18 = vor.u32 %v1197_v11, %v860_v14  ;;  %v1192_v19 = vld [vmem:[%s1829_s0 + $0x64] sm:$0xf]  ;;  %v836_v20 = vld [vmem:[%s1829_s0 + $0x70] sm:$0xf0]  ;;  %v842_v21 = vld [vmem:[%s1829_s0 + $0x68] sm:$0xf]  ;;  %v835_v23 = vor.u32 %v1194_v16, %v834_v15 }
   0x6   :  { %155 = vmatpush.bf16.msra.mxu0 %v141_v12  ;;  %v147_v22 = vand.u32 %v859_v13, %v1291_v5  ;;  %v1195_v24 = vld [vmem:[%s1829_s0 + $0x74] sm:$0xf0]  ;;  %v1193_v25 = vld [vmem:[%s1829_s0 + $0x6c] sm:$0xf]  ;;  %v844_v26 = vld [vmem:[%s1829_s0 + $0x78] sm:$0xf0]  ;;  %v839_v28 = vor.u32 %v1192_v19, %v836_v20 }
   0x7   :  { %168 = vmatpush.bf16.msra.mxu1 %v144_v17  ;;  %v150_v27 = vand.u32 %v863_v18, %v1291_v5  ;;  %v818_v29 = vld [vmem:[%s1829_s0 + $0x40] sm:$0xf]  ;;  %v1190_v30 = vld [vmem:[%s1829_s0 + $0x4c] sm:$0xf0]  ;;  %v843_v31 = vor.u32 %v1195_v24, %v842_v21  ;;  %v1188_v32 = vld [vmem:[%s1829_s0 + $0x44] sm:$0xf]  ;;  %v847_v34 = vor.u32 %v1193_v25, %v844_v26 }
   0x8   :  { %181 = vmatpush.bf16.msra.mxu2 %v147_v22  ;;  %v820_v33 = vld [vmem:[%s1829_s0 + $0x50] sm:$0xf0]  ;;  %v826_v35 = vld [vmem:[%s1829_s0 + $0x48] sm:$0xf]  ;;  %v1191_v36 = vld [vmem:[%s1829_s0 + $0x54] sm:$0xf0]  ;;  %v819_v37 = vor.u32 %v1190_v30, %v818_v29 }
   0x9   :  { %194 = vmatpush.bf16.msra.mxu3 %v150_v27  ;;  %v1189_v38 = vld [vmem:[%s1829_s0 + $0x4c] sm:$0xf]  ;;  %v828_v39 = vld [vmem:[%s1829_s0 + $0x58] sm:$0xf0]  ;;  %v823_v40 = vor.u32 %v1188_v32, %v820_v33  ;;  %v802_v41 = vld [vmem:[%s1829_s0 + $0x20] sm:$0xf]  ;;  %v827_v44 = vor.u32 %v1191_v36, %v826_v35 }
   0xa   :  { %156 = vmatpush.bf16.msra.mxu0 %v835_v23  ;;  %v1186_v42 = vld [vmem:[%s1829_s0 + $0x2c] sm:$0xf0]  ;;  %v1184_v43 = vld [vmem:[%s1829_s0 + $0x24] sm:$0xf]  ;;  %v804_v45 = vld [vmem:[%s1829_s0 + $0x30] sm:$0xf0]  ;;  %v831_v48 = vor.u32 %v1189_v38, %v828_v39 }
   0xb   :  { %169 = vmatpush.bf16.msra.mxu1 %v839_v28  ;;  %v810_v46 = vld [vmem:[%s1829_s0 + $0x28] sm:$0xf]  ;;  %v1187_v47 = vld [vmem:[%s1829_s0 + $0x34] sm:$0xf0]  ;;  %v1185_v49 = vld [vmem:[%s1829_s0 + $0x2c] sm:$0xf]  ;;  %v803_v52 = vor.u32 %v1186_v42, %v802_v41  ;;  %v807_v56 = vor.u32 %v1184_v43, %v804_v45 }
   0xc   :  { %182 = vmatpush.bf16.msra.mxu2 %v843_v31  ;;  %v812_v50 = vld [vmem:[%s1829_s0 + $0x38] sm:$0xf0]  ;;  %v786_v51 = vld [vmem:[%s1829_s0] sm:$0xf]  ;;  %v1182_v53 = vld [vmem:[%s1829_s0 + $0xc] sm:$0xf0]  ;;  %v811_v61 = vor.u32 %v1187_v47, %v810_v46 }
   0xd   :  { %195 = vmatpush.bf16.msra.mxu3 %v847_v34  ;;  %v1180_v54 = vld [vmem:[%s1829_s0 + $0x4] sm:$0xf]  ;;  %v788_v55 = vld [vmem:[%s1829_s0 + $0x10] sm:$0xf0]  ;;  %v794_v57 = vld [vmem:[%s1829_s0 + $0x8] sm:$0xf]  ;;  %v815_v2 = vor.u32 %v1185_v49, %v812_v50  ;;  %v787_v9 = vor.u32 %v1182_v53, %v786_v51 }
   0xe   :  { %157 = vmatpush.bf16.msra.mxu0 %v819_v37  ;;  %v954_v58 = vld [vmem:[%s1829_s0 + $0x120] sm:$0xf]  ;;  %v1218_v59 = vld [vmem:[%s1829_s0 + $0x12c] sm:$0x30]  ;;  %v1216_v60 = vld [vmem:[%s1829_s0 + $0x124] sm:$0xf]  ;;  %v791_v13 = vor.u32 %v1180_v54, %v788_v55 }
   0xf   :  { %170 = vmatpush.bf16.msra.mxu1 %v823_v40  ;;  %v955_v62 = vor.u32 %v1218_v59, %v954_v58  ;;  %v956_v63 = vld [vmem:[%s1829_s0 + $0x130] sm:$0x30]  ;;  %v962_v0 = vld [vmem:[%s1829_s0 + $0x128] sm:$0xf]  ;;  %v1219_v1 = vld [vmem:[%s1829_s0 + $0x134] sm:$0x30] }
  0x10   :  { %183 = vmatpush.bf16.msra.mxu2 %v827_v44  ;;  %v1183_v3 = vld [vmem:[%s1829_s0 + $0x14] sm:$0xf0]  ;;  %v959_v4 = vor.u32 %v1216_v60, %v956_v63  ;;  %v963_v6 = vor.u32 %v1219_v1, %v962_v0  ;;  %v1217_v7 = vld [vmem:[%s1829_s0 + $0x12c] sm:$0xf]  ;;  %v964_v8 = vld [vmem:[%s1829_s0 + $0x138] sm:$0x30] }
  0x11   :  { %196 = vmatpush.bf16.msra.mxu3 %v831_v48  ;;  %v1181_v10 = vld [vmem:[%s1829_s0 + $0xc] sm:$0xf]  ;;  %v796_v11 = vld [vmem:[%s1829_s0 + $0x18] sm:$0xf0]  ;;  %v967_v12 = vor.u32 %v1217_v7, %v964_v8  ;;  %v322_v14 = vand.u32 %v955_v62, %v1291_v5  ;;  %v795_v15 = vor.u32 %v1183_v3, %v794_v57  ;;  %v938_v19 = vld [vmem:[%s1829_s0 + $0x100] sm:$0xf] }
  0x12   :  { %158 = vmatpush.bf16.msra.mxu0 %v803_v52  ;;  %v325_v16 = vand.u32 %v959_v4, %v1291_v5  ;;  %v799_v17 = vor.u32 %v1181_v10, %v796_v11  ;;  %v328_v18 = vand.u32 %v963_v6, %v1291_v5  ;;  %v1214_v20 = vld [vmem:[%s1829_s0 + $0x10c] sm:$0xf0]  ;;  %v1212_v21 = vld [vmem:[%s1829_s0 + $0x104] sm:$0xf]  ;;  %v940_v23 = vld [vmem:[%s1829_s0 + $0x110] sm:$0xf0] }
  0x13   :  { %171 = vmatpush.bf16.msra.mxu1 %v807_v56  ;;  %v331_v22 = vand.u32 %v967_v12, %v1291_v5  ;;  %v946_v24 = vld [vmem:[%s1829_s0 + $0x108] sm:$0xf]  ;;  %v1215_v25 = vld [vmem:[%s1829_s0 + $0x114] sm:$0xf0]  ;;  %v1460_v26 = vld [vmem:[%s1830_s1] sm:$0x7]  ;;  %v939_v29 = vor.u32 %v1214_v20, %v938_v19  ;;  %v943_v30 = vor.u32 %v1212_v21, %v940_v23 }
  0x14   :  { %184 = vmatpush.bf16.msra.mxu2 %v811_v61  ;;  %v1213_v27 = vld [vmem:[%s1829_s0 + $0x10c] sm:$0xf]  ;;  %v948_v28 = vld [vmem:[%s1829_s0 + $0x118] sm:$0xf0]  ;;  %v947_v31 = vor.u32 %v1215_v25, %v946_v24  ;;  %v922_v32 = vld [vmem:[%s1829_s0 + $0xe0] sm:$0xf] }
  0x15   :  { %197 = vmatpush.bf16.msra.mxu3 %v815_v2  ;;  %v1210_v33 = vld [vmem:[%s1829_s0 + $0xec] sm:$0xf0]  ;;  %v1208_v34 = vld [vmem:[%s1829_s0 + $0xe4] sm:$0xf]  ;;  %v951_v35 = vor.u32 %v1213_v27, %v948_v28  ;;  %v924_v36 = vld [vmem:[%s1829_s0 + $0xf0] sm:$0xf0] }
  0x16   :  { %159 = vmatpush.bf16.msra.mxu0 %v787_v9  ;;  %v930_v37 = vld [vmem:[%s1829_s0 + $0xe8] sm:$0xf]  ;;  %v1211_v38 = vld [vmem:[%s1829_s0 + $0xf4] sm:$0xf0]  ;;  %v1209_v39 = vld [vmem:[%s1829_s0 + $0xec] sm:$0xf]  ;;  %v923_v41 = vor.u32 %v1210_v33, %v922_v32  ;;  %v927_v44 = vor.u32 %v1208_v34, %v924_v36 }
  0x17   :  { %172 = vmatpush.bf16.msra.mxu1 %v791_v13  ;;  %v932_v40 = vld [vmem:[%s1829_s0 + $0xf8] sm:$0xf0]  ;;  %v906_v42 = vld [vmem:[%s1829_s0 + $0xc0] sm:$0xf]  ;;  %v1206_v43 = vld [vmem:[%s1829_s0 + $0xcc] sm:$0xf0]  ;;  %v931_v45 = vor.u32 %v1211_v38, %v930_v37 }
  0x18   :  { %185 = vmatpush.bf16.msra.mxu2 %v795_v15  ;;  %v1204_v46 = vld [vmem:[%s1829_s0 + $0xc4] sm:$0xf]  ;;  %v908_v47 = vld [vmem:[%s1829_s0 + $0xd0] sm:$0xf0]  ;;  %v914_v48 = vld [vmem:[%s1829_s0 + $0xc8] sm:$0xf]  ;;  %v935_v49 = vor.u32 %v1209_v39, %v932_v40  ;;  %v907_v58 = vor.u32 %v1206_v43, %v906_v42 }
  0x19   :  { %198 = vmatpush.bf16.msra.mxu3 %v799_v17  ;;  %864 = vmatmul.msk.bf16.vlgmr.msra.gmra.mxu0 %vm132_vm2, %v1460_v26  ;;  %v1207_v50 = vld [vmem:[%s1829_s0 + $0xd4] sm:$0xf0]  ;;  %v1205_v51 = vld [vmem:[%s1829_s0 + $0xcc] sm:$0xf]  ;;  %v916_v52 = vld [vmem:[%s1829_s0 + $0xd8] sm:$0xf0]  ;;  %v911_v62 = vor.u32 %v1204_v46, %v908_v47 }
  0x1a   :  { %336 = vmatpush.bf16.msrb.mxu0 %v322_v14  ;;  %865 = vmatmul.msk.bf16.vlgmr.msra.gmra.mxu1 %vm132_vm2, %v1460_v26  ;;  %v890_v53 = vld [vmem:[%s1829_s0 + $0xa0] sm:$0xf]  ;;  %v1202_v54 = vld [vmem:[%s1829_s0 + $0xac] sm:$0xf0]  ;;  %v1236_v57 = vld [vmem:[%s1829_s0 + $0x1c4] sm:$0xf]  ;;  %v915_v63 = vor.u32 %v1207_v50, %v914_v48  ;;  %v919_v3 = vor.u32 %v1205_v51, %v916_v52 }
  0x1b   :  { %349 = vmatpush.bf16.msrb.mxu1 %v325_v16  ;;  %866 = vmatmul.msk.bf16.vlgmr.msra.gmra.mxu2 %vm132_vm2, %v1460_v26  ;;  %v1058_v55 = vld [vmem:[%s1829_s0 + $0x1c0] sm:$0xf]  ;;  %v1238_v56 = vld [vmem:[%s1829_s0 + $0x1cc] sm:$0x30]  ;;  %v1060_v59 = vld [vmem:[%s1829_s0 + $0x1d0] sm:$0x30]  ;;  %v891_v13 = vor.u32 %v1202_v54, %v890_v53 }
  0x1c   :  { %362 = vmatpush.bf16.msrb.mxu2 %v328_v18  ;;  %867 = vmatmul.msk.bf16.vlgmr.msra.gmra.mxu3 %vm132_vm2, %v1460_v26  ;;  %v1066_v60 = vld [vmem:[%s1829_s0 + $0x1c8] sm:$0xf]  ;;  %v1239_v61 = vld [vmem:[%s1829_s0 + $0x1d4] sm:$0x30]  ;;  %v1200_v0 = vld [vmem:[%s1829_s0 + $0xa4] sm:$0xf]  ;;  %v1059_v8 = vor.u32 %v1238_v56, %v1058_v55  ;;  %v1063_v11 = vor.u32 %v1236_v57, %v1060_v59 }
  0x1d   :  { %375 = vmatpush.bf16.msrb.mxu3 %v331_v22  ;;  %v1237_v1 = vld [vmem:[%s1829_s0 + $0x1cc] sm:$0xf]  ;;  %v1068_v2 = vld [vmem:[%s1829_s0 + $0x1d8] sm:$0x30]  ;;  %v892_v4 = vld [vmem:[%s1829_s0 + $0xb0] sm:$0xf0]  ;;  %v1067_v12 = vor.u32 %v1239_v61, %v1066_v60 }
  0x1e   :  { %337 = vmatpush.bf16.msrb.mxu0 %v939_v29  ;;  %v898_v6 = vld [vmem:[%s1829_s0 + $0xa8] sm:$0xf]  ;;  %v1203_v7 = vld [vmem:[%s1829_s0 + $0xb4] sm:$0xf0]  ;;  %v1201_v9 = vld [vmem:[%s1829_s0 + $0xac] sm:$0xf]  ;;  %v1071_v14 = vor.u32 %v1237_v1, %v1068_v2  ;;  %v895_v15 = vor.u32 %v1200_v0, %v892_v4  ;;  %v507_v18 = vand.u32 %v1059_v8, %v1291_v5  ;;  %v510_v19 = vand.u32 %v1063_v11, %v1291_v5 }
  0x1f   :  { %350 = vmatpush.bf16.msrb.mxu1 %v943_v30  ;;  %v900_v10 = vld [vmem:[%s1829_s0 + $0xb8] sm:$0xf0]  ;;  %v899_v16 = vor.u32 %v1203_v7, %v898_v6  ;;  %v513_v20 = vand.u32 %v1067_v12, %v1291_v5  ;;  %v1042_v21 = vld [vmem:[%s1829_s0 + $0x1a0] sm:$0xf]  ;;  %v1234_v22 = vld [vmem:[%s1829_s0 + $0x1ac] sm:$0xf0] }
  0x20   :  { %363 = vmatpush.bf16.msrb.mxu2 %v947_v31  ;;  %v903_v17 = vor.u32 %v1201_v9, %v900_v10  ;;  %v1232_v23 = vld [vmem:[%s1829_s0 + $0x1a4] sm:$0xf]  ;;  %v516_v24 = vand.u32 %v1071_v14, %v1291_v5  ;;  %v1044_v25 = vld [vmem:[%s1829_s0 + $0x1b0] sm:$0xf0]  ;;  %v1050_v27 = vld [vmem:[%s1829_s0 + $0x1a8] sm:$0xf]  ;;  %v1043_v31 = vor.u32 %v1234_v22, %v1042_v21 }
  0x21   :  { %376 = vmatpush.bf16.msrb.mxu3 %v951_v35  ;;  %v1235_v28 = vld [vmem:[%s1829_s0 + $0x1b4] sm:$0xf0]  ;;  %v1233_v29 = vld [vmem:[%s1829_s0 + $0x1ac] sm:$0xf]  ;;  %v1052_v30 = vld [vmem:[%s1829_s0 + $0x1b8] sm:$0xf0]  ;;  %v1047_v32 = vor.u32 %v1232_v23, %v1044_v25 }
  0x22   :  { %338 = vmatpush.bf16.msrb.mxu0 %v923_v41  ;;  %v1051_v33 = vor.u32 %v1235_v28, %v1050_v27  ;;  %v1026_v34 = vld [vmem:[%s1829_s0 + $0x180] sm:$0xf]  ;;  %v1230_v35 = vld [vmem:[%s1829_s0 + $0x18c] sm:$0xf0]  ;;  %v1228_v36 = vld [vmem:[%s1829_s0 + $0x184] sm:$0xf]  ;;  %v1055_v37 = vor.u32 %v1233_v29, %v1052_v30 }
  0x23   :  { %351 = vmatpush.bf16.msrb.mxu1 %v927_v44  ;;  %v1028_v38 = vld [vmem:[%s1829_s0 + $0x190] sm:$0xf0]  ;;  %v1034_v39 = vld [vmem:[%s1829_s0 + $0x188] sm:$0xf]  ;;  %v1231_v40 = vld [vmem:[%s1829_s0 + $0x194] sm:$0xf0]  ;;  %v1027_v43 = vor.u32 %v1230_v35, %v1026_v34 }
  0x24   :  { %364 = vmatpush.bf16.msrb.mxu2 %v931_v45  ;;  %v1229_v41 = vld [vmem:[%s1829_s0 + $0x18c] sm:$0xf]  ;;  %v1036_v42 = vld [vmem:[%s1829_s0 + $0x198] sm:$0xf0]  ;;  %v1010_v44 = vld [vmem:[%s1829_s0 + $0x160] sm:$0xf]  ;;  %v1031_v46 = vor.u32 %v1228_v36, %v1028_v38  ;;  %v1035_v47 = vor.u32 %v1231_v40, %v1034_v39 }
  0x25   :  { %377 = vmatpush.bf16.msrb.mxu3 %v935_v49  ;;  %v1226_v45 = vld [vmem:[%s1829_s0 + $0x16c] sm:$0xf0]  ;;  %v1224_v48 = vld [vmem:[%s1829_s0 + $0x164] sm:$0xf]  ;;  %v1012_v49 = vld [vmem:[%s1829_s0 + $0x170] sm:$0xf0]  ;;  %v1039_v51 = vor.u32 %v1229_v41, %v1036_v42 }
  0x26   :  { %339 = vmatpush.bf16.msrb.mxu0 %v907_v58  ;;  %v1018_v50 = vld [vmem:[%s1829_s0 + $0x168] sm:$0xf]  ;;  %v1227_v52 = vld [vmem:[%s1829_s0 + $0x174] sm:$0xf0]  ;;  %v1225_v53 = vld [vmem:[%s1829_s0 + $0x16c] sm:$0xf]  ;;  %v1011_v60 = vor.u32 %v1226_v45, %v1010_v44  ;;  %v1015_v0 = vor.u32 %v1224_v48, %v1012_v49 }
  0x27   :  { %352 = vmatpush.bf16.msrb.mxu1 %v911_v62  ;;  %v1020_v54 = vld [vmem:[%s1829_s0 + $0x178] sm:$0xf0]  ;;  %v994_v55 = vld [vmem:[%s1829_s0 + $0x140] sm:$0xf]  ;;  %v1222_v56 = vld [vmem:[%s1829_s0 + $0x14c] sm:$0xf0]  ;;  %v1019_v1 = vor.u32 %v1227_v52, %v1018_v50 }
  0x28   :  { %365 = vmatpush.bf16.msrb.mxu2 %v915_v63  ;;  %v1162_v57 = vld [vmem:[%s1829_s0 + $0x260] sm:$0xf]  ;;  %v1258_v58 = vld [vmem:[%s1829_s0 + $0x26c] sm:$0x30]  ;;  %v1256_v59 = vld [vmem:[%s1829_s0 + $0x264] sm:$0xf]  ;;  %v1023_v6 = vor.u32 %v1225_v53, %v1020_v54 }
  0x29   :  { %378 = vmatpush.bf16.msrb.mxu3 %v919_v3  ;;  %v1164_v61 = vld [vmem:[%s1829_s0 + $0x270] sm:$0x30]  ;;  %v1170_v62 = vld [vmem:[%s1829_s0 + $0x268] sm:$0xf]  ;;  %v1259_v63 = vld [vmem:[%s1829_s0 + $0x274] sm:$0x30]  ;;  %v1163_v10 = vor.u32 %v1258_v58, %v1162_v57 }
  0x2a   :  { %340 = vmatpush.bf16.msrb.mxu0 %v891_v13  ;;  %v1220_v2 = vld [vmem:[%s1829_s0 + $0x144] sm:$0xf]  ;;  %v1257_v3 = vld [vmem:[%s1829_s0 + $0x26c] sm:$0xf]  ;;  %v1172_v4 = vld [vmem:[%s1829_s0 + $0x278] sm:$0x30]  ;;  %v1167_v13 = vor.u32 %v1256_v59, %v1164_v61  ;;  %v1171_v14 = vor.u32 %v1259_v63, %v1170_v62 }
  0x2b   :  { %353 = vmatpush.bf16.msrb.mxu1 %v895_v15  ;;  %v996_v7 = vld [vmem:[%s1829_s0 + $0x150] sm:$0xf0]  ;;  %v1002_v8 = vld [vmem:[%s1829_s0 + $0x148] sm:$0xf]  ;;  %v1223_v9 = vld [vmem:[%s1829_s0 + $0x154] sm:$0xf0]  ;;  %v995_v15 = vor.u32 %v1222_v56, %v994_v55  ;;  %v692_v21 = vand.u32 %v1163_v10, %v1291_v5 }
  0x2c   :  { %366 = vmatpush.bf16.msrb.mxu2 %v899_v16  ;;  %v1221_v11 = vld [vmem:[%s1829_s0 + $0x14c] sm:$0xf]  ;;  %v1004_v12 = vld [vmem:[%s1829_s0 + $0x158] sm:$0xf0]  ;;  %v1175_v16 = vor.u32 %v1257_v3, %v1172_v4  ;;  %v1264_v22 = vmov 0   ;;  %v695_v23 = vand.u32 %v1167_v13, %v1291_v5  ;;  %vm778_vm5 = vmor %vm777_vm4, %vm776_vm3 }
  0x2d   :  { %379 = vmatpush.bf16.msrb.mxu3 %v903_v17  ;;  %968 = vmatmul.msk.bf16.vlgmr.msrb.gmra.mxu0 %vm132_vm2, %v1460_v26  ;;  %v999_v17 = vor.u32 %v1220_v2, %v996_v7  ;;  %v1146_v25 = vld [vmem:[%s1829_s0 + $0x240] sm:$0xf]  ;;  %v1254_v27 = vld [vmem:[%s1829_s0 + $0x24c] sm:$0xf0]  ;;  %v1252_v28 = vld [vmem:[%s1829_s0 + $0x244] sm:$0xf] }
  0x2e   :  { %521 = vmatpush.bf16.msra.mxu0 %v507_v18  ;;  %969 = vmatmul.msk.bf16.vlgmr.msrb.gmra.mxu1 %vm132_vm2, %v1460_v26  ;;  %v1003_v18 = vor.u32 %v1223_v9, %v1002_v8  ;;  %v701_v29 = vand.u32 %v1175_v16, %v1291_v5  ;;  %v1148_v30 = vld [vmem:[%s1829_s0 + $0x250] sm:$0xf0]  ;;  %v1147_v34 = vor.u32 %v1254_v27, %v1146_v25  ;;  %v1250_v38 = vld [vmem:[%s1829_s0 + $0x22c] sm:$0xf0]  ;;  %v1248_v39 = vld [vmem:[%s1829_s0 + $0x224] sm:$0xf] }
  0x2f   :  { %534 = vmatpush.bf16.msra.mxu1 %v510_v19  ;;  %970 = vmatmul.msk.bf16.vlgmr.msrb.gmra.mxu2 %vm132_vm2, %v1460_v26  ;;  %v759_v19 = vld [vmem:[%s1831_s2] sm:$0x3f]  ;;  %v1151_v35 = vor.u32 %v1252_v28, %v1148_v30  ;;  %v1132_v41 = vld [vmem:[%s1829_s0 + $0x230] sm:$0xf0]  ;;  %v1138_v42 = vld [vmem:[%s1829_s0 + $0x228] sm:$0xf] }
  0x30   :  { %547 = vmatpush.bf16.msra.mxu2 %v513_v20  ;;  %971 = vmatmul.msk.bf16.vlgmr.msrb.gmra.mxu3 %vm132_vm2, %v1460_v26  ;;  %v1007_v20 = vor.u32 %v1221_v11, %v1004_v12  ;;  %v1249_v44 = vld [vmem:[%s1829_s0 + $0x22c] sm:$0xf]  ;;  %v1140_v45 = vld [vmem:[%s1829_s0 + $0x238] sm:$0xf0]  ;;  %v1114_v49 = vld [vmem:[%s1829_s0 + $0x200] sm:$0xf] }
  0x31   :  { %560 = vmatpush.bf16.msra.mxu3 %v516_v24  ;;  %1262 = vset.pattern.permute.xlu0 %v1264_v22  ;;  %v698_v24 = vand.u32 %v1171_v14, %v1291_v5  ;;  %v1156_v5 = vld [vmem:[%s1829_s0 + $0x258] sm:$0xf0]  ;;  %v1246_v50 = vld [vmem:[%s1829_s0 + $0x20c] sm:$0xf0]  ;;  %v1143_v52 = vor.u32 %v1249_v44, %v1140_v45  ;;  %v1116_v53 = vld [vmem:[%s1829_s0 + $0x210] sm:$0xf0] }
  0x32   :  { %522 = vmatpush.bf16.msra.mxu0 %v1043_v31  ;;  %762 = vperm.xlu0 %1262, %v759_v19   ;;  %v1154_v31 = vld [vmem:[%s1829_s0 + $0x248] sm:$0xf]  ;;  %v1247_v55 = vld [vmem:[%s1829_s0 + $0x214] sm:$0xf0]  ;;  %v1245_v56 = vld [vmem:[%s1829_s0 + $0x20c] sm:$0xf]  ;;  %v1115_v58 = vor.u32 %v1246_v50, %v1114_v49 }
  0x33   :  { %535 = vmatpush.bf16.msra.mxu1 %v1047_v32  ;;  %v1255_v32 = vld [vmem:[%s1829_s0 + $0x254] sm:$0xf0]  ;;  %v1122_v54 = vld [vmem:[%s1829_s0 + $0x208] sm:$0xf]  ;;  %v1124_v57 = vld [vmem:[%s1829_s0 + $0x218] sm:$0xf0] }
  0x34   :  { %548 = vmatpush.bf16.msra.mxu2 %v1051_v33  ;;  %v1253_v33 = vld [vmem:[%s1829_s0 + $0x24c] sm:$0xf]  ;;  %v1155_v36 = vor.u32 %v1255_v32, %v1154_v31  ;;  %v1098_v61 = vld [vmem:[%s1829_s0 + $0x1e0] sm:$0xf]  ;;  %v1242_v62 = vld [vmem:[%s1829_s0 + $0x1ec] sm:$0xf0] }
  0x35   :  { %561 = vmatpush.bf16.msra.mxu3 %v1055_v37  ;;  %v1130_v37 = vld [vmem:[%s1829_s0 + $0x220] sm:$0xf]  ;;  %v1159_v40 = vor.u32 %v1253_v33, %v1156_v5  ;;  %v1240_v63 = vld [vmem:[%s1829_s0 + $0x1e4] sm:$0xf]  ;;  %v1106_v2 = vld [vmem:[%s1829_s0 + $0x1e8] sm:$0xf]  ;;  %v1099_v7 = vor.u32 %v1242_v62, %v1098_v61 }
  0x36   :  { %523 = vmatpush.bf16.msra.mxu0 %v1027_v43  ;;  %v1251_v43 = vld [vmem:[%s1829_s0 + $0x234] sm:$0xf0]  ;;  %v1241_v4 = vld [vmem:[%s1829_s0 + $0x1ec] sm:$0xf] }
  0x37   :  { %536 = vmatpush.bf16.msra.mxu1 %v1031_v46  ;;  %v1131_v46 = vor.u32 %v1250_v38, %v1130_v37  ;;  %v1139_v48 = vor.u32 %v1251_v43, %v1138_v42  ;;  %v1243_v3 = vld [vmem:[%s1829_s0 + $0x1f4] sm:$0xf0] }
  0x38   :  { %549 = vmatpush.bf16.msra.mxu2 %v1035_v47  ;;  %v1135_v47 = vor.u32 %v1248_v39, %v1132_v41  ;;  %v1107_v9 = vor.u32 %v1243_v3, %v1106_v2 }
  0x39   :  { %562 = vmatpush.bf16.msra.mxu3 %v1039_v51  ;;  %v1244_v51 = vld [vmem:[%s1829_s0 + $0x204] sm:$0xf] }
  0x3a   :  { %524 = vmatpush.bf16.msra.mxu0 %v1011_v60  ;;  %v1119_v59 = vor.u32 %v1244_v51, %v1116_v53  ;;  %v1123_v60 = vor.u32 %v1247_v55, %v1122_v54 }
  0x3b   :  { %537 = vmatpush.bf16.msra.mxu1 %v1015_v0  ;;  %v1127_v0 = vor.u32 %v1245_v56, %v1124_v57 }
  0x3c   :  { %550 = vmatpush.bf16.msra.mxu2 %v1019_v1  ;;  %v1100_v1 = vld [vmem:[%s1829_s0 + $0x1f0] sm:$0xf0] }
  0x3d   :  { %563 = vmatpush.bf16.msra.mxu3 %v1023_v6  ;;  %v1108_v6 = vld [vmem:[%s1829_s0 + $0x1f8] sm:$0xf0]  ;;  %v1103_v8 = vor.u32 %v1240_v63, %v1100_v1 }
  0x3e   :  { %525 = vmatpush.bf16.msra.mxu0 %v995_v15  ;;  %v1111_v10 = vor.u32 %v1241_v4, %v1108_v6 }
  0x3f   :  { %538 = vmatpush.bf16.msra.mxu1 %v999_v17 }
  0x40   :  { %551 = vmatpush.bf16.msra.mxu2 %v1003_v18 }
  0x41   :  { %564 = vmatpush.bf16.msra.mxu3 %v1007_v20  ;;  %1072 = vmatmul.msk.bf16.vlgmr.msra.gmra.mxu0 %vm132_vm2, %v1460_v26 }
  0x42   :  { %706 = vmatpush.bf16.msrb.mxu0 %v692_v21  ;;  %1073 = vmatmul.msk.bf16.vlgmr.msra.gmra.mxu1 %vm132_vm2, %v1460_v26 }
  0x43   :  { %719 = vmatpush.bf16.msrb.mxu1 %v695_v23  ;;  %1074 = vmatmul.msk.bf16.vlgmr.msra.gmra.mxu2 %vm132_vm2, %v1460_v26 }
  0x44   :  { %732 = vmatpush.bf16.msrb.mxu2 %v698_v24  ;;  %1075 = vmatmul.msk.bf16.vlgmr.msra.gmra.mxu3 %vm132_vm2, %v1460_v26 }
  0x45   :  { %745 = vmatpush.bf16.msrb.mxu3 %v701_v29 }
  0x46   :  { %707 = vmatpush.bf16.msrb.mxu0 %v1147_v34 }
  0x47   :  { %720 = vmatpush.bf16.msrb.mxu1 %v1151_v35 }
  0x48   :  { %733 = vmatpush.bf16.msrb.mxu2 %v1155_v36 }
  0x49   :  { %746 = vmatpush.bf16.msrb.mxu3 %v1159_v40 }
  0x4a   :  { %708 = vmatpush.bf16.msrb.mxu0 %v1131_v46 }
  0x4b   :  { %721 = vmatpush.bf16.msrb.mxu1 %v1135_v47 }
  0x4c   :  { %734 = vmatpush.bf16.msrb.mxu2 %v1139_v48 }
  0x4d   :  { %747 = vmatpush.bf16.msrb.mxu3 %v1143_v52 }
  0x4e   :  { %709 = vmatpush.bf16.msrb.mxu0 %v1115_v58 }
  0x4f   :  { %722 = vmatpush.bf16.msrb.mxu1 %v1119_v59 }
  0x50   :  { %735 = vmatpush.bf16.msrb.mxu2 %v1123_v60 }
  0x51   :  { %748 = vmatpush.bf16.msrb.mxu3 %v1127_v0 }
  0x52   :  { %710 = vmatpush.bf16.msrb.mxu0 %v1099_v7 }
  0x53   :  { %723 = vmatpush.bf16.msrb.mxu1 %v1103_v8 }
  0x54   :  { %736 = vmatpush.bf16.msrb.mxu2 %v1107_v9 }
  0x55   :  { %749 = vmatpush.bf16.msrb.mxu3 %v1111_v10  ;;  %1176 = vmatmul.msk.bf16.vlgmr.msrb.gmra.mxu0 %vm132_vm2, %v1460_v26 }
  0x56   :  { %1177 = vmatmul.msk.bf16.vlgmr.msrb.gmra.mxu1 %vm132_vm2, %v1460_v26 }
  0x57   :  { %1178 = vmatmul.msk.bf16.vlgmr.msrb.gmra.mxu2 %vm132_vm2, %v1460_v26 }
  0x58   :  { %1179 = vmatmul.msk.bf16.vlgmr.msrb.gmra.mxu3 %vm132_vm2, %v1460_v26 }
  0x96   :  { %v161_v11 = vpop.f32.mrf.mxu0 }
  0x97   :  { %v174_v12 = vpop.f32.mrf.mxu1 }
  0x9e   :  { %v187_v13 = vpop.f32.mrf.mxu2  ;;  %v163_v15 = vpop.f32.mrf.mxu0 }
  0x9f   :  { %v200_v14 = vpop.f32.mrf.mxu3  ;;  %v176_v16 = vpop.f32.mrf.mxu1 }
  0xa4   :  { %v763_v39 = vpop.permute.xlu0 %762 }
  0xa6   :  { %v189_v17 = vpop.f32.mrf.mxu2 }
  0xa7   :  { %v202_v18 = vpop.f32.mrf.mxu3 }
  0xaa   :  { %v342_v19 = vpop.f32.mrf.mxu0 }
  0xab   :  { %v355_v20 = vpop.f32.mrf.mxu1  ;;  %v385_v33 = vmax.f32 %v161_v11, %v342_v19 }
  0xac   :  { %v386_v5 = vmax.f32 %v174_v12, %v355_v20 }
  0xb2   :  { %v368_v21 = vpop.f32.mrf.mxu2  ;;  %v344_v23 = vpop.f32.mrf.mxu0 }
  0xb3   :  { %v381_v22 = vpop.f32.mrf.mxu3  ;;  %v357_v24 = vpop.f32.mrf.mxu1  ;;  %v387_v44 = vmax.f32 %v187_v13, %v368_v21 }
  0xb4   :  { %v388_v46 = vmax.f32 %v200_v14, %v381_v22 }
  0xba   :  { %v370_v25 = vpop.f32.mrf.mxu2 }
  0xbb   :  { %v383_v27 = vpop.f32.mrf.mxu3 }
  0xbe   :  { %v527_v28 = vpop.f32.mrf.mxu0 }
  0xbf   :  { %v540_v29 = vpop.f32.mrf.mxu1  ;;  %v570_v35 = vmax.f32 %v385_v33, %v527_v28 }
  0xc0   :  { %v571_v37 = vmax.f32 %v386_v5, %v540_v29 }
  0xc6   :  { %v553_v30 = vpop.f32.mrf.mxu2  ;;  %v529_v31 = vpop.f32.mrf.mxu0 }
  0xc7   :  { %v566_v26 = vpop.f32.mrf.mxu3  ;;  %v542_v32 = vpop.f32.mrf.mxu1  ;;  %v572_v48 = vmax.f32 %v387_v44, %v553_v30 }
  0xc8   :  { %v573_v50 = vmax.f32 %v388_v46, %v566_v26 }
  0xce   :  { %v555_v34 = vpop.f32.mrf.mxu2 }
  0xcf   :  { %v568_v36 = vpop.f32.mrf.mxu3 }
  0xd2   :  { %v712_v38 = vpop.f32.mrf.mxu0 }
  0xd3   :  { %v755_v40 = vmax.f32 %v570_v35, %v712_v38  ;;  %v725_v41 = vpop.f32.mrf.mxu1 }
  0xd4   :  { %v756_v42 = vmax.f32 %v571_v37, %v725_v41 }
  0xd5   :  { %v765_v43 = vadd.f32 %v763_v39, %v755_v40 }
  0xd6   :  { %v766_v45 = vadd.f32 %v763_v39, %v756_v42 }
  0xd7   :  { %v769_v47 = vmax.f32 %v765_v43, 0.0 }
  0xd8   :  { %v770_v49 = vmax.f32 %v766_v45, 0.0 }
  0xda   :  { %v738_v51 = vpop.f32.mrf.mxu2  ;;  %v773_v52 = vpack.c.bf16 %v770_v49, %v769_v47  ;;  %v714_v55 = vpop.f32.mrf.mxu0 }
  0xdb   :  { %v757_v53 = vmax.f32 %v572_v48, %v738_v51  ;;  %v751_v54 = vpop.f32.mrf.mxu3  ;;  %v727_v57 = vpop.f32.mrf.mxu1 }
  0xdc   :  { %v758_v56 = vmax.f32 %v573_v50, %v751_v54  ;;  %775 = vst [vmem:[%s1832_s3] sm:$0x77] %v773_v52 }
  0xdd   :  { %v767_v58 = vadd.f32 %v763_v39, %v757_v53 }
  0xde   :  { %v768_v59 = vadd.f32 %v763_v39, %v758_v56 }
  0xdf   :  { %v771_v60 = vmax.f32 %v767_v58, 0.0 }
  0xe0   :  { %v772_v61 = vmax.f32 %v768_v59, 0.0 }
  0xe2   :  { %v774_v62 = vpack.c.bf16 %v772_v61, %v771_v60  ;;  %v740_v63 = vpop.f32.mrf.mxu2 }
  0xe3   :  { %v753_v0 = vpop.f32.mrf.mxu3 }
  0xe4   :  { %779 = vst.msk [vmem:[%s1832_s3 + $0x8] sm:$0x77] %vm778_vm5, %v774_v62 }

// kernel: lenet5_forward.4
= control target key start
LH: loop header
LB: loop body
LE: loop exit
PB: predicated region body
PF: predicated region fallthrough
CT: control target
= control target key end

     0   :  { %vm106_vm0 = vcmask 1042432   ;;  %vm102_vm1 = vcmask 179200   ;;  %v746_v35 = vmov 0   ;;  %vm486_vm2 = vcmask 404480   ;;  %s925_s0 = inlined_call_operand.vmem [shape: bf16[4,150,50], index: 0, kind: input, shape index: {}]   ;;  %s926_s1 = inlined_call_operand.vmem [shape: bf16[16,150], index: 1, kind: input, shape index: {}]   ;;  %s927_s2 = inlined_call_operand.vmem [shape: f32[16,1], index: 2, kind: input, shape index: {}]   ;;  %s928_s3 = inlined_call_operand.vmem [shape: bf16[16,50], index: 3, kind: output, shape index: {}]  }
   0x1   :  { %v715_v0 = vld [vmem:[%s925_s0 + $0x38] sm:$0xff]  ;;  %v724_v1 = vld [vmem:[%s925_s0 + $0x84] sm:$0xff]  ;;  %v714_v4 = vld [vmem:[%s925_s0 + $0x30] sm:$0xff]  ;;  %745 = vset.pattern.permute.xlu0 %v746_v35 }
   0x2   :  { %v35_v2 = vld [vmem:[%s925_s0 + $0x48] sm:$0x7]  ;;  %110 = vmatpush.bf16.msra.mxu0 %v715_v0  ;;  %218 = vmatpush.bf16.msra.mxu2 %v724_v1  ;;  %v612_v5 = vld [vmem:[%s925_s0 + $0xe0] sm:$0x7]  ;;  %v722_v14 = vld [vmem:[%s925_s0 + $0x74] sm:$0xff] }
   0x3   :  { %v82_v3 = vunpack.c.l.b16 %v35_v2  ;;  %v723_v7 = vld [vmem:[%s925_s0 + $0x7c] sm:$0xff]  ;;  %v305_v8 = vunpack.c.l.b16 %v612_v5  ;;  %v713_v12 = vld [vmem:[%s925_s0 + $0x28] sm:$0xff]  ;;  %v733_v15 = vld [vmem:[%s925_s0 + $0xd0] sm:$0xff] }
   0x4   :  { %v716_v11 = vld [vmem:[%s925_s0 + $0x40] sm:$0xff]  ;;  %v734_v17 = vld [vmem:[%s925_s0 + $0xd8] sm:$0xff]  ;;  %v497_v18 = vld [vmem:[%s926_s1 + $0x8] sm:$0xf0] }
   0x5   :  { %v92_v6 = vpack.c.b16 %v82_v3, %v82_v3  ;;  %v315_v10 = vpack.c.b16 %v305_v8, %v305_v8  ;;  %v706_v16 = vld [vmem:[%s926_s1 + $0x4] sm:$0xf]  ;;  %v742_v19 = vld [vmem:[%s925_s0 + $0x11c] sm:$0xff]  ;;  %v721_v22 = vld [vmem:[%s925_s0 + $0x6c] sm:$0xff] }
   0x6   :  { %111 = vmatpush.bf16.msra.mxu0 %v714_v4  ;;  %219 = vmatpush.bf16.msra.mxu2 %v723_v7  ;;  %v811_v20 = vor.u32 %v706_v16, %v497_v18  ;;  %v712_v21 = vld [vmem:[%s925_s0 + $0x20] sm:$0xff]  ;;  %v732_v23 = vld [vmem:[%s925_s0 + $0xc8] sm:$0xff]  ;;  %v741_v24 = vld [vmem:[%s925_s0 + $0x114] sm:$0xff] }
   0x7   :  { %v108_v9 = vsel %vm106_vm0, %v92_v6, 0  ;;  %v326_v13 = vsel %vm106_vm0, %v315_v10, 0  ;;  %v711_v25 = vld [vmem:[%s925_s0 + $0x18] sm:$0xff]  ;;  %v720_v26 = vld [vmem:[%s925_s0 + $0x64] sm:$0xff]  ;;  %v710_v28 = vld [vmem:[%s925_s0 + $0x10] sm:$0xff] }
   0x8   :  { %130 = vmatpush.bf16.msra.mxu1 %v108_v9  ;;  %348 = vmatpush.bf16.msra.mxu3 %v326_v13  ;;  %v731_v27 = vld [vmem:[%s925_s0 + $0xc0] sm:$0xff]  ;;  %v740_v29 = vld [vmem:[%s925_s0 + $0x10c] sm:$0xff]  ;;  %v556_v30 = vld [vmem:[%s925_s0 + $0x94] sm:$0x7] }
   0x9   :  { %v668_v31 = vld [vmem:[%s925_s0 + $0x12c] sm:$0x7]  ;;  %v468_v32 = vld [vmem:[%s927_s2] sm:$0xff]  ;;  %v730_v34 = vld [vmem:[%s925_s0 + $0xb8] sm:$0xff]  ;;  %v195_v37 = vunpack.c.l.b16 %v556_v30 }
   0xa   :  { %112 = vmatpush.bf16.msra.mxu0 %v713_v12  ;;  %220 = vmatpush.bf16.msra.mxu2 %v722_v14  ;;  %v719_v33 = vld [vmem:[%s925_s0 + $0x5c] sm:$0xff]  ;;  %v739_v36 = vld [vmem:[%s925_s0 + $0x104] sm:$0xff]  ;;  %v415_v38 = vunpack.c.l.b16 %v668_v31  ;;  %v718_v40 = vld [vmem:[%s925_s0 + $0x54] sm:$0xff] }
   0xb   :  { %472 = vperm.xlu0 %745, %v468_v32   ;;  %v709_v39 = vld [vmem:[%s925_s0 + $0x8] sm:$0xff]  ;;  %v729_v41 = vld [vmem:[%s925_s0 + $0xb0] sm:$0xff]  ;;  %v708_v42 = vld [vmem:[%s925_s0] sm:$0xff]  ;;  %v205_v44 = vpack.c.b16 %v195_v37, %v195_v37 }
   0xc   :  { %131 = vmatpush.bf16.msra.mxu1 %v716_v11  ;;  %349 = vmatpush.bf16.msra.mxu3 %v734_v17  ;;  %v738_v43 = vld [vmem:[%s925_s0 + $0xfc] sm:$0xff]  ;;  %v425_v45 = vpack.c.b16 %v415_v38, %v415_v38  ;;  %v707_v47 = vld [vmem:[%s926_s1 + $0x4] sm:$0xf0]  ;;  %v717_v49 = vld [vmem:[%s925_s0 + $0x4c] sm:$0xff] }
   0xd   :  { %v495_v46 = vld [vmem:[%s926_s1] sm:$0xf]  ;;  %v469_v48 = vld [vmem:[%s927_s2 + $0x8] sm:$0xff]  ;;  %v216_v52 = vsel %vm106_vm0, %v205_v44, 0  ;;  %v737_v53 = vld [vmem:[%s925_s0 + $0xf4] sm:$0xff] }
   0xe   :  { %113 = vmatpush.bf16.msra.mxu0 %v712_v21  ;;  %221 = vmatpush.bf16.msra.mxu2 %v721_v22  ;;  %v728_v50 = vld [vmem:[%s925_s0 + $0xa8] sm:$0xff]  ;;  %v496_v51 = vor.u32 %v707_v47, %v495_v46  ;;  %v436_v54 = vsel %vm106_vm0, %v425_v45, 0  ;;  %v727_v55 = vld [vmem:[%s925_s0 + $0xa0] sm:$0xff]  ;;  %v726_v59 = vld [vmem:[%s925_s0 + $0x98] sm:$0xff] }
   0xf   :  { %537 = vmatmul.msk.bf16.vlgmr.msra.gmra.mxu1 %vm102_vm1, %v811_v20  ;;  %649 = vmatmul.msk.bf16.vlgmr.msra.gmra.mxu3 %vm102_vm1, %v811_v20  ;;  %v725_v56 = vld [vmem:[%s925_s0 + $0x8c] sm:$0xff]  ;;  %v743_v57 = vld [vmem:[%s925_s0 + $0x124] sm:$0xff] }
  0x10   :  { %328 = vmatpush.bf16.msrb.mxu1 %v733_v15  ;;  %438 = vmatpush.bf16.msrb.mxu3 %v742_v19  ;;  %v736_v58 = vld [vmem:[%s925_s0 + $0xec] sm:$0xff]  ;;  %v735_v60 = vld [vmem:[%s925_s0 + $0xe4] sm:$0xff] }
  0x12   :  { %114 = vmatpush.bf16.msra.mxu0 %v711_v25  ;;  %222 = vmatpush.bf16.msra.mxu2 %v720_v26 }
  0x13   :  { %477 = vperm.xlu0 %745, %v469_v48  }
  0x14   :  { %329 = vmatpush.bf16.msrb.mxu1 %v732_v23  ;;  %439 = vmatpush.bf16.msrb.mxu3 %v741_v24 }
  0x16   :  { %115 = vmatpush.bf16.msra.mxu0 %v710_v28  ;;  %223 = vmatpush.bf16.msra.mxu2 %v719_v33 }
  0x18   :  { %330 = vmatpush.bf16.msrb.mxu1 %v731_v27  ;;  %440 = vmatpush.bf16.msrb.mxu3 %v740_v29 }
  0x1a   :  { %116 = vmatpush.bf16.msra.mxu0 %v709_v39  ;;  %224 = vmatpush.bf16.msra.mxu2 %v718_v40 }
  0x1c   :  { %331 = vmatpush.bf16.msrb.mxu1 %v730_v34  ;;  %441 = vmatpush.bf16.msrb.mxu3 %v739_v36 }
  0x1e   :  { %117 = vmatpush.bf16.msra.mxu0 %v708_v42  ;;  %225 = vmatpush.bf16.msra.mxu2 %v717_v49 }
  0x20   :  { %332 = vmatpush.bf16.msrb.mxu1 %v729_v41  ;;  %442 = vmatpush.bf16.msrb.mxu3 %v738_v43 }
  0x21   :  { %118 = vmatmul.bf16.vlgmr.msra.gmra.mxu0 %v496_v51  ;;  %226 = vmatmul.bf16.vlgmr.msra.gmra.mxu2 %v496_v51 }
  0x22   :  { %238 = vmatpush.bf16.msrb.mxu2 %v216_v52  ;;  %458 = vmatpush.bf16.msrb.mxu0 %v436_v54 }
  0x24   :  { %333 = vmatpush.bf16.msrb.mxu1 %v728_v50  ;;  %443 = vmatpush.bf16.msrb.mxu3 %v737_v53 }
  0x26   :  { %239 = vmatpush.bf16.msrb.mxu2 %v725_v56  ;;  %459 = vmatpush.bf16.msrb.mxu0 %v743_v57 }
  0x28   :  { %334 = vmatpush.bf16.msrb.mxu1 %v727_v55  ;;  %444 = vmatpush.bf16.msrb.mxu3 %v736_v58 }
  0x2c   :  { %335 = vmatpush.bf16.msrb.mxu1 %v726_v59  ;;  %445 = vmatpush.bf16.msrb.mxu3 %v735_v60 }
  0x2f   :  { %336 = vmatmul.bf16.vlgmr.msrb.gmra.mxu1 %v496_v51  ;;  %446 = vmatmul.bf16.vlgmr.msrb.gmra.mxu3 %v496_v51 }
  0x31   :  { %705 = vmatmul.msk.bf16.vlgmr.msrb.gmra.mxu0 %vm102_vm1, %v811_v20  ;;  %593 = vmatmul.msk.bf16.vlgmr.msrb.gmra.mxu2 %vm102_vm1, %v811_v20 }
  0x7d   :  { %v473_v15 = vpop.permute.xlu0 %472 }
  0x85   :  { %v478_v31 = vpop.permute.xlu0 %477 }
  0x8c   :  { %v133_v61 = vpop.f32.mrf.mxu1 }
  0x92   :  { %v351_v62 = vpop.f32.mrf.mxu3 }
  0x94   :  { %v135_v1 = vpop.f32.mrf.mxu1 }
  0x9a   :  { %v353_v2 = vpop.f32.mrf.mxu3 }
  0x9e   :  { %v119_v63 = vpop.f32.mrf.mxu0 }
  0x9f   :  { %v134_v9 = vadd.f32 %v133_v61, %v119_v63 }
  0xa4   :  { %v227_v0 = vpop.f32.mrf.mxu2 }
  0xa6   :  { %v121_v3 = vpop.f32.mrf.mxu0 }
  0xa7   :  { %v136_v19 = vadd.f32 %v135_v1, %v121_v3 }
  0xac   :  { %v229_v4 = vpop.f32.mrf.mxu2  ;;  %v337_v5 = vpop.f32.mrf.mxu1 }
  0xad   :  { %v352_v11 = vadd.f32 %v351_v62, %v337_v5 }
  0xae   :  { %v461_v6 = vpop.f32.mrf.mxu0 }
  0xb2   :  { %v447_v7 = vpop.f32.mrf.mxu3 }
  0xb3   :  { %v462_v12 = vadd.f32 %v461_v6, %v447_v7 }
  0xb4   :  { %v241_v8 = vpop.f32.mrf.mxu2  ;;  %v339_v17 = vpop.f32.mrf.mxu1 }
  0xb5   :  { %v242_v10 = vadd.f32 %v241_v8, %v227_v0  ;;  %v354_v24 = vadd.f32 %v353_v2, %v339_v17 }
  0xb6   :  { %v463_v23 = vpop.f32.mrf.mxu0 }
  0xb7   :  { %v246_v13 = vmax.f32 %v134_v9, %v242_v10 }
  0xb9   :  { %v356_v14 = vmax.f32 %v246_v13, %v352_v11 }
  0xba   :  { %v449_v22 = vpop.f32.mrf.mxu3 }
  0xbb   :  { %v466_v16 = vmax.f32 %v356_v14, %v462_v12  ;;  %v464_v28 = vadd.f32 %v463_v23, %v449_v22 }
  0xbc   :  { %v243_v18 = vpop.f32.mrf.mxu2 }
  0xbd   :  { %v480_v20 = vadd.f32 %v473_v15, %v466_v16  ;;  %v244_v21 = vadd.f32 %v243_v18, %v229_v4 }
  0xbf   :  { %v482_v25 = vmax.f32 %v480_v20, 0.0  ;;  %v247_v26 = vmax.f32 %v136_v19, %v244_v21 }
  0xc1   :  { %v484_v27 = vpack.c.bf16 %v482_v25, %v482_v25  ;;  %v357_v29 = vmax.f32 %v247_v26, %v354_v24 }
  0xc3   :  { %487 = vst.msk [vmem:[%s928_s3] sm:$0xf] %vm486_vm2, %v484_v27  ;;  %v467_v30 = vmax.f32 %v357_v29, %v464_v28 }
  0xc5   :  { %v481_v32 = vadd.f32 %v478_v31, %v467_v30 }
  0xc7   :  { %v483_v33 = vmax.f32 %v481_v32, 0.0 }
  0xc9   :  { %v485_v34 = vpack.c.bf16 %v483_v33, %v483_v33 }
  0xcb   :  { %488 = vst.msk [vmem:[%s928_s3 + $0x4] sm:$0xf] %vm486_vm2, %v485_v34 }

// kernel: lenet5_forward.5
= control target key start
LH: loop header
LB: loop body
LE: loop exit
PB: predicated region body
PF: predicated region fallthrough
CT: control target
= control target key end

     0   :  { %v1378_v2 = vmov 0   ;;  %vm507_vm0 = vcmask 130048   ;;  %vm1019_vm1 = vcmask 15360   ;;  %vm1021_vm2 = vcmask 9216   ;;  %s1901_s0 = inlined_call_operand.vmem [shape: bf16[400,2], index: 0, kind: input, shape index: {}]   ;;  %s1902_s2 = inlined_call_operand.vmem [shape: f32[128,1], index: 2, kind: input, shape index: {}]   ;;  %s1903_s1 = inlined_call_operand.vmem [shape: bf16[128,400], index: 1, kind: input, shape index: {}]   ;;  %s1904_s4 = inlined_call_operand.vmem [shape: f32[128,1], index: 4, kind: input, shape index: {}]   ;;  %s1905_s6 = inlined_call_operand.vmem [shape: f32[10,1], index: 6, kind: input, shape index: {}]   ;;  %s1906_s3 = inlined_call_operand.vmem [shape: bf16[128,128], index: 3, kind: input, shape index: {}]   ;;  %s1907_s5 = inlined_call_operand.vmem [shape: bf16[10,128], index: 5, kind: input, shape index: {}]   ;;  %s1908_s7 = inlined_call_operand.vmem [shape: f32[10,2], index: 7, kind: output, shape index: {}]  }
   0x1   :  { %v1338_v0 = vld [vmem:[%s1901_s0 + $0x38] sm:$0xff]  ;;  %1375 = vset.pattern.permute.xlu0 %v1378_v2  ;;  %1376 = vset.pattern.permute.xlu1 %v1378_v2  ;;  %v1337_v3 = vld [vmem:[%s1901_s0 + $0x30] sm:$0xff]  ;;  %v1336_v6 = vld [vmem:[%s1901_s0 + $0x28] sm:$0xff] }
   0x2   :  { %v1346_v1 = vld [vmem:[%s1901_s0 + $0x78] sm:$0xff]  ;;  %1377 = vset.pattern.permute.xlu2 %v1378_v2  ;;  %532 = vmatpush.bf16.msra.mxu0 %v1338_v0  ;;  %v1345_v4 = vld [vmem:[%s1901_s0 + $0x70] sm:$0xff]  ;;  %v1344_v7 = vld [vmem:[%s1901_s0 + $0x68] sm:$0xff] }
   0x3   :  { %581 = vmatpush.bf16.msra.mxu1 %v1346_v1  ;;  %1365 = vmatpush.bf16.msra.mxu2 %v1346_v1  ;;  %v123_v5 = vld [vmem:[%s1902_s2 + $0x70] sm:$0xff]  ;;  %v1335_v8 = vld [vmem:[%s1901_s0 + $0x20] sm:$0xff]  ;;  %v124_v10 = vld [vmem:[%s1902_s2 + $0x78] sm:$0xff] }
   0x4   :  { %197 = vperm.xlu0 %1375, %v123_v5   ;;  %v1343_v9 = vld [vmem:[%s1901_s0 + $0x60] sm:$0xff]  ;;  %v1334_v11 = vld [vmem:[%s1901_s0 + $0x18] sm:$0xff]  ;;  %v1333_v13 = vld [vmem:[%s1901_s0 + $0x10] sm:$0xff] }
   0x5   :  { %v1342_v12 = vld [vmem:[%s1901_s0 + $0x58] sm:$0xff]  ;;  %v1341_v14 = vld [vmem:[%s1901_s0 + $0x50] sm:$0xff]  ;;  %v117_v15 = vld [vmem:[%s1902_s2 + $0x40] sm:$0xff] }
   0x6   :  { %533 = vmatpush.bf16.msra.mxu0 %v1337_v3  ;;  %v121_v16 = vld [vmem:[%s1902_s2 + $0x60] sm:$0xff]  ;;  %v119_v17 = vld [vmem:[%s1902_s2 + $0x50] sm:$0xff]  ;;  %v1332_v18 = vld [vmem:[%s1901_s0 + $0x8] sm:$0xff] }
   0x7   :  { %582 = vmatpush.bf16.msra.mxu1 %v1345_v4  ;;  %1366 = vmatpush.bf16.msra.mxu2 %v1345_v4  ;;  %v1340_v19 = vld [vmem:[%s1901_s0 + $0x48] sm:$0xff]  ;;  %v1331_v20 = vld [vmem:[%s1901_s0] sm:$0xff]  ;;  %v1301_v24 = vld [vmem:[%s1903_s1 + $0xc] sm:$0xf0] }
   0x8   :  { %187 = vperm.xlu1 %1376, %v121_v16   ;;  %177 = vperm.xlu2 %1377, %v119_v17   ;;  %v122_v21 = vld [vmem:[%s1902_s2 + $0x68] sm:$0xff]  ;;  %v1339_v22 = vld [vmem:[%s1901_s0 + $0x40] sm:$0xff]  ;;  %v1031_v26 = vld [vmem:[%s1903_s1 + $0x10] sm:$0xf0] }
   0x9   :  { %v1029_v23 = vld [vmem:[%s1903_s1] sm:$0xf]  ;;  %v1299_v25 = vld [vmem:[%s1903_s1 + $0x4] sm:$0xf]  ;;  %v116_v27 = vld [vmem:[%s1902_s2 + $0x38] sm:$0xff] }
   0xa   :  { %534 = vmatpush.bf16.msra.mxu0 %v1336_v6  ;;  %v1323_v28 = vld [vmem:[%s1903_s1 + $0xc4] sm:$0xf]  ;;  %v1127_v29 = vld [vmem:[%s1903_s1 + $0xd0] sm:$0xf0]  ;;  %v1354_v30 = vld [vmem:[%s1901_s0 + $0xb8] sm:$0xff]  ;;  %v1030_v31 = vor.u32 %v1301_v24, %v1029_v23  ;;  %v1034_v32 = vor.u32 %v1299_v25, %v1031_v26 }
   0xb   :  { %583 = vmatpush.bf16.msra.mxu1 %v1344_v7  ;;  %1367 = vmatpush.bf16.msra.mxu2 %v1344_v7  ;;  %v1130_v33 = vor.u32 %v1323_v28, %v1127_v29  ;;  %v1353_v34 = vld [vmem:[%s1901_s0 + $0xb0] sm:$0xff]  ;;  %v120_v36 = vld [vmem:[%s1902_s2 + $0x58] sm:$0xff]  ;;  %v118_v37 = vld [vmem:[%s1902_s2 + $0x48] sm:$0xff] }
   0xc   :  { %202 = vperm.xlu0 %1375, %v124_v10   ;;  %v111_v35 = vld [vmem:[%s1902_s2 + $0x10] sm:$0xff]  ;;  %v1352_v38 = vld [vmem:[%s1901_s0 + $0xa8] sm:$0xff]  ;;  %v1351_v39 = vld [vmem:[%s1901_s0 + $0xa0] sm:$0xff] }
   0xd   :  { %v115_v40 = vld [vmem:[%s1902_s2 + $0x30] sm:$0xff]  ;;  %v113_v41 = vld [vmem:[%s1902_s2 + $0x20] sm:$0xff]  ;;  %v110_v46 = vld [vmem:[%s1902_s2 + $0x8] sm:$0xff] }
   0xe   :  { %535 = vmatpush.bf16.msra.mxu0 %v1335_v8  ;;  %v1045_v42 = vld [vmem:[%s1903_s1 + $0x20] sm:$0xf]  ;;  %v1305_v43 = vld [vmem:[%s1903_s1 + $0x2c] sm:$0xf0]  ;;  %v1303_v44 = vld [vmem:[%s1903_s1 + $0x24] sm:$0xf] }
   0xf   :  { %584 = vmatpush.bf16.msra.mxu1 %v1343_v9  ;;  %1368 = vmatpush.bf16.msra.mxu2 %v1343_v9  ;;  %v1047_v45 = vld [vmem:[%s1903_s1 + $0x30] sm:$0xf0]  ;;  %v1327_v47 = vld [vmem:[%s1903_s1 + $0xe4] sm:$0xf]  ;;  %v1350_v49 = vld [vmem:[%s1901_s0 + $0x98] sm:$0xff]  ;;  %v1046_v50 = vor.u32 %v1305_v43, %v1045_v42 }
  0x10   :  { %192 = vperm.xlu1 %1376, %v122_v21   ;;  %182 = vperm.xlu2 %1377, %v120_v36   ;;  %v1143_v48 = vld [vmem:[%s1903_s1 + $0xf0] sm:$0xf0]  ;;  %v1050_v51 = vor.u32 %v1303_v44, %v1047_v45  ;;  %v114_v54 = vld [vmem:[%s1902_s2 + $0x28] sm:$0xff]  ;;  %v112_v55 = vld [vmem:[%s1902_s2 + $0x18] sm:$0xff] }
  0x11   :  { %v1146_v52 = vor.u32 %v1327_v47, %v1143_v48  ;;  %v1349_v53 = vld [vmem:[%s1901_s0 + $0x90] sm:$0xff]  ;;  %v1348_v56 = vld [vmem:[%s1901_s0 + $0x88] sm:$0xff]  ;;  %v1347_v57 = vld [vmem:[%s1901_s0 + $0x80] sm:$0xff] }
  0x12   :  { %536 = vmatpush.bf16.msra.mxu0 %v1334_v11  ;;  %v109_v58 = vld [vmem:[%s1902_s2] sm:$0xff]  ;;  %v1309_v60 = vld [vmem:[%s1903_s1 + $0x4c] sm:$0xf0]  ;;  %v1063_v62 = vld [vmem:[%s1903_s1 + $0x50] sm:$0xf0] }
  0x13   :  { %585 = vmatpush.bf16.msra.mxu1 %v1342_v12  ;;  %1369 = vmatpush.bf16.msra.mxu2 %v1342_v12  ;;  %v1061_v59 = vld [vmem:[%s1903_s1 + $0x40] sm:$0xf]  ;;  %v1307_v61 = vld [vmem:[%s1903_s1 + $0x44] sm:$0xf]  ;;  %v1037_v63 = vld [vmem:[%s1903_s1 + $0x8] sm:$0xf] }
  0x14   :  { %167 = vperm.xlu0 %1375, %v117_v15   ;;  %v1302_v0 = vld [vmem:[%s1903_s1 + $0x14] sm:$0xf0]  ;;  %v1062_v1 = vor.u32 %v1309_v60, %v1061_v59  ;;  %v1066_v2 = vor.u32 %v1307_v61, %v1063_v62  ;;  %v1077_v4 = vld [vmem:[%s1903_s1 + $0x60] sm:$0xf]  ;;  %v1313_v5 = vld [vmem:[%s1903_s1 + $0x6c] sm:$0xf0] }
  0x15   :  { %v1038_v3 = vor.u32 %v1302_v0, %v1037_v63  ;;  %v1311_v6 = vld [vmem:[%s1903_s1 + $0x64] sm:$0xf]  ;;  %v1079_v7 = vld [vmem:[%s1903_s1 + $0x70] sm:$0xf0]  ;;  %v1053_v8 = vld [vmem:[%s1903_s1 + $0x28] sm:$0xf]  ;;  %v1078_v10 = vor.u32 %v1313_v5, %v1077_v4 }
  0x16   :  { %537 = vmatpush.bf16.msra.mxu0 %v1333_v13  ;;  %v1306_v9 = vld [vmem:[%s1903_s1 + $0x34] sm:$0xf0]  ;;  %v1082_v11 = vor.u32 %v1311_v6, %v1079_v7  ;;  %v1355_v13 = vld [vmem:[%s1901_s0 + $0xc0] sm:$0xff]  ;;  %v1103_v15 = vld [vmem:[%s1903_s1 + $0x98] sm:$0xf0] }
  0x17   :  { %586 = vmatpush.bf16.msra.mxu1 %v1341_v14  ;;  %1370 = vmatpush.bf16.msra.mxu2 %v1341_v14  ;;  %v1054_v12 = vor.u32 %v1306_v9, %v1053_v8  ;;  %v1316_v14 = vld [vmem:[%s1903_s1 + $0x8c] sm:$0xf]  ;;  %v1093_v17 = vld [vmem:[%s1903_s1 + $0x80] sm:$0xf]  ;;  %v1069_v21 = vld [vmem:[%s1903_s1 + $0x48] sm:$0xf] }
  0x18   :  { %172 = vperm.xlu1 %1376, %v118_v37   ;;  %157 = vperm.xlu2 %1377, %v115_v40   ;;  %v1106_v16 = vor.u32 %v1316_v14, %v1103_v15  ;;  %v1320_v26 = vld [vmem:[%s1903_s1 + $0xac] sm:$0xf]  ;;  %v1109_v29 = vld [vmem:[%s1903_s1 + $0xa0] sm:$0xf]  ;;  %v779_v45 = vld [vmem:[%s1904_s4 + $0x58] sm:$0xff] }
  0x19   :  { %1373 = vmatpush.bf16.msra.mxu3 %v1355_v13  ;;  %v1324_v40 = vld [vmem:[%s1903_s1 + $0xcc] sm:$0xf]  ;;  %v1125_v47 = vld [vmem:[%s1903_s1 + $0xc0] sm:$0xf]  ;;  %v1325_v48 = vld [vmem:[%s1903_s1 + $0xcc] sm:$0xf0] }
  0x1a   :  { %538 = vmatpush.bf16.msra.mxu0 %v1332_v18  ;;  %v1317_v18 = vld [vmem:[%s1903_s1 + $0x8c] sm:$0xf0]  ;;  %v776_v59 = vld [vmem:[%s1904_s4 + $0x40] sm:$0xff]  ;;  %v1328_v60 = vld [vmem:[%s1903_s1 + $0xec] sm:$0xf] }
  0x1b   :  { %587 = vmatpush.bf16.msra.mxu1 %v1340_v19  ;;  %1371 = vmatpush.bf16.msra.mxu2 %v1340_v19  ;;  %v1315_v19 = vld [vmem:[%s1903_s1 + $0x84] sm:$0xf]  ;;  %v1094_v23 = vor.u32 %v1317_v18, %v1093_v17  ;;  %v1151_v61 = vld [vmem:[%s1903_s1 + $0xf8] sm:$0xf0]  ;;  %v1304_v4 = vld [vmem:[%s1903_s1 + $0x2c] sm:$0xf] }
  0x1c   :  { %162 = vperm.xlu0 %1375, %v116_v27   ;;  %1259 = vmatmul.msk.bf16.vlgmr.msra.gmra.mxu3 %vm507_vm0, %v1106_v16  ;;  %v1119_v27 = vld [vmem:[%s1903_s1 + $0xb8] sm:$0xf0]  ;;  %v1154_v63 = vor.u32 %v1328_v60, %v1151_v61  ;;  %v1117_v6 = vld [vmem:[%s1903_s1 + $0xa8] sm:$0xf]  ;;  %v1322_v7 = vld [vmem:[%s1903_s1 + $0xb4] sm:$0xf0] }
  0x1d   :  { %v1122_v28 = vor.u32 %v1320_v26, %v1119_v27  ;;  %v1055_v5 = vld [vmem:[%s1903_s1 + $0x38] sm:$0xf0]  ;;  %v768_v15 = vld [vmem:[%s1904_s4] sm:$0xff]  ;;  %v770_v17 = vld [vmem:[%s1904_s4 + $0x10] sm:$0xff] }
  0x1e   :  { %539 = vmatpush.bf16.msra.mxu0 %v1331_v20  ;;  %v1095_v20 = vld [vmem:[%s1903_s1 + $0x90] sm:$0xf0]  ;;  %v783_v16 = vld [vmem:[%s1904_s4 + $0x78] sm:$0xff] }
  0x1f   :  { %588 = vmatpush.bf16.msra.mxu1 %v1339_v22  ;;  %1372 = vmatpush.bf16.msra.mxu2 %v1339_v22  ;;  %v1310_v22 = vld [vmem:[%s1903_s1 + $0x54] sm:$0xf0]  ;;  %v1098_v24 = vor.u32 %v1315_v19, %v1095_v20  ;;  %v988_v19 = vld [vmem:[%s1905_s6 + $0x8] sm:$0x3]  ;;  %v778_v20 = vld [vmem:[%s1904_s4 + $0x50] sm:$0xff] }
  0x20   :  { %147 = vperm.xlu1 %1376, %v113_v41   ;;  %152 = vperm.xlu2 %1377, %v114_v54   ;;  %v1070_v25 = vor.u32 %v1310_v22, %v1069_v21  ;;  %v1135_v41 = vld [vmem:[%s1903_s1 + $0xd8] sm:$0xf0]  ;;  %v1308_v21 = vld [vmem:[%s1903_s1 + $0x4c] sm:$0xf] }
  0x21   :  { %540 = vmatmul.bf16.vlgmr.msra.gmra.mxu0 %v1030_v31  ;;  %v1319_v31 = vld [vmem:[%s1903_s1 + $0xa4] sm:$0xf]  ;;  %v1138_v43 = vor.u32 %v1324_v40, %v1135_v41  ;;  %v1071_v22 = vld [vmem:[%s1903_s1 + $0x58] sm:$0xf0] }
  0x22   :  { %589 = vmatmul.bf16.vlgmr.msra.gmra.mxu1 %v1034_v32  ;;  %619 = vmatmul.bf16.vlgmr.msra.gmra.mxu2 %v1130_v33  ;;  %v1111_v32 = vld [vmem:[%s1903_s1 + $0xb0] sm:$0xf0]  ;;  %v1085_v33 = vld [vmem:[%s1903_s1 + $0x68] sm:$0xf]  ;;  %v1074_v27 = vor.u32 %v1308_v21, %v1071_v22  ;;  %v772_v41 = vld [vmem:[%s1904_s4 + $0x20] sm:$0xff] }
  0x23   :  { %630 = vmatpush.bf16.msrb.mxu2 %v1354_v30  ;;  %686 = vmatpush.bf16.msrb.mxu1 %v1355_v13  ;;  %v1321_v30 = vld [vmem:[%s1903_s1 + $0xac] sm:$0xf0]  ;;  %v1114_v36 = vor.u32 %v1319_v31, %v1111_v32 }
  0x24   :  { %137 = vperm.xlu0 %1375, %v111_v35   ;;  %v1110_v35 = vor.u32 %v1321_v30, %v1109_v29 }
  0x27   :  { %631 = vmatpush.bf16.msrb.mxu2 %v1353_v34  ;;  %v1314_v34 = vld [vmem:[%s1903_s1 + $0x74] sm:$0xf0] }
  0x28   :  { %142 = vperm.xlu1 %1376, %v112_v55   ;;  %127 = vperm.xlu2 %1377, %v109_v58   ;;  %v1086_v37 = vor.u32 %v1314_v34, %v1085_v33  ;;  %v774_v58 = vld [vmem:[%s1904_s4 + $0x30] sm:$0xff]  ;;  %v777_v34 = vld [vmem:[%s1904_s4 + $0x48] sm:$0xff] }
  0x2b   :  { %632 = vmatpush.bf16.msrb.mxu2 %v1352_v38  ;;  %v780_v38 = vld [vmem:[%s1904_s4 + $0x60] sm:$0xff] }
  0x2c   :  { %132 = vperm.xlu0 %1375, %v110_v46   ;;  %1260 = vmatmul.msk.bf16.gmra.mxu3 %vm507_vm0, %v1122_v28  ;;  %v781_v46 = vld [vmem:[%s1904_s4 + $0x68] sm:$0xff] }
  0x2d   :  { %v769_v28 = vld [vmem:[%s1904_s4 + $0x8] sm:$0xff] }
  0x2f   :  { %633 = vmatpush.bf16.msrb.mxu2 %v1351_v39  ;;  %v782_v39 = vld [vmem:[%s1904_s4 + $0x70] sm:$0xff] }
  0x30   :  { %856 = vperm.xlu1 %1376, %v782_v39   ;;  %861 = vperm.xlu2 %1377, %v783_v16  }
  0x31   :  { %545 = vmatmul.bf16.gmra.mxu0 %v1046_v50  ;;  %v1039_v50 = vld [vmem:[%s1903_s1 + $0x18] sm:$0xf0] }
  0x32   :  { %594 = vmatmul.bf16.gmra.mxu1 %v1050_v51  ;;  %624 = vmatmul.bf16.gmra.mxu2 %v1146_v52  ;;  %v1101_v51 = vld [vmem:[%s1903_s1 + $0x88] sm:$0xf]  ;;  %v1318_v52 = vld [vmem:[%s1903_s1 + $0x94] sm:$0xf0] }
  0x33   :  { %634 = vmatpush.bf16.msrb.mxu2 %v1350_v49  ;;  %v1300_v49 = vld [vmem:[%s1903_s1 + $0xc] sm:$0xf]  ;;  %v1102_v55 = vor.u32 %v1318_v52, %v1101_v51 }
  0x34   :  { %846 = vperm.xlu0 %1375, %v780_v38   ;;  %v1042_v54 = vor.u32 %v1300_v49, %v1039_v50  ;;  %v1330_v49 = vld [vmem:[%s1903_s1 + $0xf4] sm:$0xf0] }
  0x37   :  { %635 = vmatpush.bf16.msrb.mxu2 %v1349_v53  ;;  %v1126_v53 = vor.u32 %v1325_v48, %v1125_v47  ;;  %v1149_v48 = vld [vmem:[%s1903_s1 + $0xe8] sm:$0xf] }
  0x38   :  { %851 = vperm.xlu1 %1376, %v781_v46   ;;  %836 = vperm.xlu2 %1377, %v778_v20   ;;  %v1087_v46 = vld [vmem:[%s1903_s1 + $0x78] sm:$0xf0] }
  0x3b   :  { %636 = vmatpush.bf16.msrb.mxu2 %v1348_v56 }
  0x3c   :  { %1261 = vmatmul.msk.bf16.gmra.mxu3 %vm507_vm0, %v1138_v43  ;;  %841 = vperm.xlu0 %1375, %v779_v45   ;;  %v1312_v45 = vld [vmem:[%s1903_s1 + $0x6c] sm:$0xf] }
  0x3d   :  { %v1090_v51 = vor.u32 %v1312_v45, %v1087_v46 }
  0x3f   :  { %637 = vmatpush.bf16.msrb.mxu2 %v1347_v57 }
  0x40   :  { %826 = vperm.xlu1 %1376, %v776_v59   ;;  %831 = vperm.xlu2 %1377, %v777_v34   ;;  %v771_v59 = vld [vmem:[%s1904_s4 + $0x18] sm:$0xff] }
  0x41   :  { %550 = vmatmul.bf16.gmra.mxu0 %v1062_v1  ;;  %v773_v1 = vld [vmem:[%s1904_s4 + $0x28] sm:$0xff] }
  0x42   :  { %599 = vmatmul.bf16.gmra.mxu1 %v1066_v2  ;;  %638 = vmatmul.bf16.vlgmr.msrb.gmra.mxu2 %v1038_v3  ;;  %v1141_v2 = vld [vmem:[%s1903_s1 + $0xe0] sm:$0xf]  ;;  %v1329_v3 = vld [vmem:[%s1903_s1 + $0xec] sm:$0xf0] }
  0x43   :  { %v1142_v9 = vor.u32 %v1329_v3, %v1141_v2  ;;  %v987_v3 = vld [vmem:[%s1905_s6] sm:$0xff] }
  0x44   :  { %816 = vperm.xlu0 %1375, %v774_v58  }
  0x48   :  { %806 = vperm.xlu2 %1377, %v772_v41  }
  0x4c   :  { %1262 = vmatmul.msk.bf16.gmra.mxu3 %vm507_vm0, %v1154_v63  ;;  %811 = vperm.xlu0 %1375, %v773_v1  }
  0x50   :  { %801 = vperm.xlu2 %1377, %v771_v59  }
  0x51   :  { %555 = vmatmul.bf16.gmra.mxu0 %v1078_v10  ;;  %v1058_v10 = vor.u32 %v1304_v4, %v1055_v5 }
  0x52   :  { %604 = vmatmul.bf16.gmra.mxu1 %v1082_v11  ;;  %643 = vmatmul.bf16.gmra.mxu2 %v1054_v12  ;;  %v775_v11 = vld [vmem:[%s1904_s4 + $0x38] sm:$0xff]  ;;  %v1118_v12 = vor.u32 %v1322_v7, %v1117_v6 }
  0x53   :  { %821 = vperm.xlu1 %1376, %v775_v11  }
  0x54   :  { %786 = vperm.xlu0 %1375, %v768_v15  }
  0x58   :  { %991 = vperm.xlu2 %1377, %v987_v3  }
  0x5b   :  { %796 = vperm.xlu1 %1376, %v770_v17  }
  0x5c   :  { %996 = vperm.xlu0 %1375, %v988_v19  }
  0x61   :  { %560 = vmatmul.bf16.gmra.mxu0 %v1094_v23 }
  0x62   :  { %609 = vmatmul.bf16.gmra.mxu1 %v1098_v24  ;;  %648 = vmatmul.bf16.gmra.mxu2 %v1070_v25  ;;  %v1676_v42 = vpop.permute.xlu2 %177  ;;  %v1133_v24 = vld [vmem:[%s1903_s1 + $0xc8] sm:$0xf]  ;;  %v1326_v25 = vld [vmem:[%s1903_s1 + $0xd4] sm:$0xf0] }
  0x63   :  { %v1134_v31 = vor.u32 %v1326_v25, %v1133_v24  ;;  %791 = vperm.xlu1 %1376, %v769_v28  }
  0x6a   :  { %v1705_v56 = vpop.permute.xlu2 %182 }
  0x71   :  { %565 = vmatmul.bf16.gmra.mxu0 %v1110_v35 }
  0x72   :  { %614 = vmatmul.bf16.gmra.mxu1 %v1114_v36  ;;  %653 = vmatmul.bf16.gmra.mxu2 %v1086_v37  ;;  %v1724_v0 = vpop.permute.xlu2 %157 }
  0x76   :  { %v1678_v44 = vpop.permute.xlu0 %197 }
  0x7a   :  { %v1748_v8 = vpop.permute.xlu1 %187  ;;  %v1756_v14 = vpop.permute.xlu2 %152 }
  0x7e   :  { %v1707_v57 = vpop.permute.xlu0 %202 }
  0x81   :  { %570 = vmatmul.bf16.gmra.mxu0 %v1126_v53 }
  0x82   :  { %1255 = vmatmul.msk.bf16.vlgmr.msrb.gmra.mxu1 %vm507_vm0, %v1042_v54  ;;  %658 = vmatmul.bf16.gmra.mxu2 %v1102_v55  ;;  %v1767_v18 = vpop.permute.xlu1 %192  ;;  %v128_v26 = vpop.permute.xlu2 %127  ;;  %v1150_v54 = vor.u32 %v1330_v49, %v1149_v48 }
  0x86   :  { %v1722_v62 = vpop.permute.xlu0 %167 }
  0x8a   :  { %v1790_v33 = vpop.permute.xlu1 %172 }
  0x8e   :  { %v1753_v13 = vpop.permute.xlu0 %162 }
  0x91   :  { %575 = vmatmul.bf16.gmra.mxu0 %v1142_v9 }
  0x92   :  { %1256 = vmatmul.msk.bf16.gmra.mxu1 %vm507_vm0, %v1058_v10  ;;  %663 = vmatmul.bf16.gmra.mxu2 %v1118_v12  ;;  %v148_v47 = vpop.permute.xlu1 %147 }
  0x96   :  { %v138_v23 = vpop.permute.xlu0 %137 }
  0x9a   :  { %v143_v60 = vpop.permute.xlu1 %142 }
  0x9e   :  { %v541_v29 = vpop.f32.mrf.mxu0  ;;  %v133_v36 = vpop.permute.xlu0 %132 }
  0x9f   :  { %v590_v30 = vpop.f32.mrf.mxu1  ;;  %v542_v32 = vadd.f32 %v541_v29, %v128_v26 }
  0xa1   :  { %v591_v35 = vadd.f32 %v590_v30, %v542_v32 }
  0xa2   :  { %1257 = vmatmul.msk.bf16.gmra.mxu1 %vm507_vm0, %v1074_v27  ;;  %668 = vmatmul.bf16.gmra.mxu2 %v1134_v31 }
  0xa5   :  { %v1796_v37 = vpop.f32.mrf.mxu2 }
  0xa6   :  { %v543_v38 = vpop.f32.mrf.mxu0 }
  0xa7   :  { %v592_v39 = vpop.f32.mrf.mxu1  ;;  %v544_v40 = vadd.f32 %v543_v38, %v133_v36 }
  0xa9   :  { %v593_v43 = vadd.f32 %v592_v39, %v544_v40 }
  0xad   :  { %v1813_v50 = vpop.f32.mrf.mxu2 }
  0xae   :  { %v546_v52 = vpop.f32.mrf.mxu0 }
  0xaf   :  { %v595_v53 = vpop.f32.mrf.mxu1  ;;  %v547_v55 = vadd.f32 %v546_v52, %v138_v23 }
  0xb1   :  { %v596_v58 = vadd.f32 %v595_v53, %v547_v55 }
  0xb2   :  { %1258 = vmatmul.msk.bf16.gmra.mxu1 %vm507_vm0, %v1090_v51  ;;  %673 = vmatmul.bf16.gmra.mxu2 %v1150_v54 }
  0xb5   :  { %v1819_v61 = vpop.f32.mrf.mxu2 }
  0xb6   :  { %v548_v63 = vpop.f32.mrf.mxu0 }
  0xb7   :  { %v597_v1 = vpop.f32.mrf.mxu1  ;;  %v549_v2 = vadd.f32 %v548_v63, %v143_v60 }
  0xb9   :  { %v598_v4 = vadd.f32 %v597_v1, %v549_v2 }
  0xbd   :  { %v1824_v5 = vpop.f32.mrf.mxu2 }
  0xbe   :  { %v551_v6 = vpop.f32.mrf.mxu0 }
  0xbf   :  { %v600_v7 = vpop.f32.mrf.mxu1  ;;  %v552_v9 = vadd.f32 %v551_v6, %v148_v47 }
  0xc1   :  { %v601_v10 = vadd.f32 %v600_v7, %v552_v9 }
  0xc5   :  { %v639_v11 = vpop.f32.mrf.mxu2 }
  0xc6   :  { %v640_v12 = vadd.f32 %v639_v11, %v591_v35  ;;  %v553_v15 = vpop.f32.mrf.mxu0 }
  0xc7   :  { %v602_v16 = vpop.f32.mrf.mxu1  ;;  %v554_v17 = vadd.f32 %v553_v15, %v1756_v14 }
  0xc9   :  { %v603_v19 = vadd.f32 %v602_v16, %v554_v17 }
  0xcd   :  { %v641_v20 = vpop.f32.mrf.mxu2 }
  0xce   :  { %v642_v21 = vadd.f32 %v641_v20, %v593_v43  ;;  %v556_v22 = vpop.f32.mrf.mxu0 }
  0xcf   :  { %v605_v23 = vpop.f32.mrf.mxu1  ;;  %v557_v24 = vadd.f32 %v556_v22, %v1724_v0 }
  0xd1   :  { %v606_v25 = vadd.f32 %v605_v23, %v557_v24 }
  0xd5   :  { %v644_v26 = vpop.f32.mrf.mxu2 }
  0xd6   :  { %v645_v27 = vadd.f32 %v644_v26, %v596_v58  ;;  %v558_v28 = vpop.f32.mrf.mxu0 }
  0xd7   :  { %v607_v29 = vpop.f32.mrf.mxu1  ;;  %v559_v30 = vadd.f32 %v558_v28, %v1753_v13  ;;  %v708_v13 = vpop.f32.mrf.mxu3 }
  0xd9   :  { %v608_v31 = vadd.f32 %v607_v29, %v559_v30 }
  0xdd   :  { %v646_v32 = vpop.f32.mrf.mxu2 }
  0xde   :  { %v647_v34 = vadd.f32 %v646_v32, %v598_v4  ;;  %v561_v35 = vpop.f32.mrf.mxu0 }
  0xdf   :  { %v610_v36 = vpop.f32.mrf.mxu1  ;;  %v562_v14 = vadd.f32 %v561_v35, %v1722_v62  ;;  %v710_v55 = vpop.f32.mrf.mxu3 }
  0xe1   :  { %v611_v38 = vadd.f32 %v610_v36, %v562_v14 }
  0xe5   :  { %v649_v39 = vpop.f32.mrf.mxu2 }
  0xe6   :  { %v650_v40 = vadd.f32 %v649_v39, %v601_v10  ;;  %v563_v49 = vpop.f32.mrf.mxu0 }
  0xe7   :  { %v612_v41 = vpop.f32.mrf.mxu1  ;;  %v564_v1 = vadd.f32 %v563_v49, %v1790_v33  ;;  %v1837_v9 = vpop.f32.mrf.mxu3 }
  0xe9   :  { %v613_v7 = vadd.f32 %v612_v41, %v564_v1 }
  0xed   :  { %v651_v43 = vpop.f32.mrf.mxu2 }
  0xee   :  { %v652_v0 = vadd.f32 %v651_v43, %v603_v19  ;;  %v566_v62 = vpop.f32.mrf.mxu0 }
  0xef   :  { %v1830_v45 = vpop.f32.mrf.mxu1  ;;  %v715_v23 = vpop.f32.mrf.mxu3 }
  0xf5   :  { %v654_v46 = vpop.f32.mrf.mxu2 }
  0xf6   :  { %v655_v47 = vadd.f32 %v654_v46, %v606_v25  ;;  %v568_v10 = vpop.f32.mrf.mxu0 }
  0xf7   :  { %v1832_v48 = vpop.f32.mrf.mxu1  ;;  %v718_v32 = vpop.f32.mrf.mxu3 }
  0xfd   :  { %v656_v51 = vpop.f32.mrf.mxu2 }
  0xfe   :  { %v657_v52 = vadd.f32 %v656_v51, %v608_v31  ;;  %v571_v24 = vpop.f32.mrf.mxu0 }
  0xff   :  { %v688_v53 = vpop.f32.mrf.mxu1 }
 0x100   :  { %v689_v54 = vadd.f32 %v688_v53, %v640_v12 }
 0x102   :  { %v728_v3 = vmax.f32 %v689_v54, 0.0 }
 0x105   :  { %v659_v58 = vpop.f32.mrf.mxu2 }
 0x106   :  { %v660_v59 = vadd.f32 %v659_v58, %v611_v38  ;;  %v573_v35 = vpop.f32.mrf.mxu0 }
 0x107   :  { %v690_v60 = vpop.f32.mrf.mxu1 }
 0x108   :  { %v691_v63 = vadd.f32 %v690_v60, %v642_v21  ;;  %v709_v2 = vadd.f32 %v708_v13, %v660_v59  ;;  %v574_v59 = vadd.f32 %v573_v35, %v1767_v18 }
 0x10a   :  { %v729_v4 = vmax.f32 %v691_v63, 0.0  ;;  %v736_v17 = vmax.f32 %v709_v2, 0.0  ;;  %v572_v63 = vadd.f32 %v571_v24, %v1748_v8 }
 0x10c   :  { %v1835_v6 = vpack.c.bf16 %v729_v4, %v728_v3  ;;  %v569_v4 = vadd.f32 %v568_v10, %v1705_v56  ;;  %v621_v18 = vadd.f32 %v1796_v37, %v572_v63 }
 0x10d   :  { %v661_v11 = vpop.f32.mrf.mxu2 }
 0x10e   :  { %v662_v15 = vadd.f32 %v661_v11, %v613_v7  ;;  %v576_v46 = vpop.f32.mrf.mxu0 }
 0x10f   :  { %v693_v12 = vpop.f32.mrf.mxu1 }
 0x110   :  { %v711_v16 = vadd.f32 %v710_v55, %v662_v15  ;;  %v694_v21 = vadd.f32 %v693_v12, %v645_v27  ;;  %v720_v27 = vpop.f32.mrf.mxu3 }
 0x112   :  { %v737_v19 = vmax.f32 %v711_v16, 0.0  ;;  %v730_v26 = vmax.f32 %v694_v21, 0.0 }
 0x114   :  { %v1839_v20 = vpack.c.bf16 %v737_v19, %v736_v17 }
 0x115   :  { %v664_v22 = vpop.f32.mrf.mxu2 }
 0x116   :  { %v578_v54 = vpop.f32.mrf.mxu0 }
 0x117   :  { %v695_v33 = vpop.f32.mrf.mxu1 }
 0x118   :  { %v696_v25 = vadd.f32 %v695_v33, %v647_v34  ;;  %v577_v34 = vadd.f32 %v576_v46, %v1678_v44  ;;  %v723_v53 = vpop.f32.mrf.mxu3  ;;  %v623_v44 = vadd.f32 %v1813_v50, %v574_v59 }
 0x11a   :  { %v731_v28 = vmax.f32 %v696_v25, 0.0  ;;  %v626_v1 = vadd.f32 %v1819_v61, %v577_v34 }
 0x11c   :  { %v1841_v29 = vpack.c.bf16 %v731_v28, %v730_v26 }
 0x11d   :  { %v666_v30 = vpop.f32.mrf.mxu2 }
 0x11f   :  { %v698_v31 = vpop.f32.mrf.mxu1 }
 0x120   :  { %v699_v36 = vadd.f32 %v698_v31, %v650_v40  ;;  %v725_v17 = vpop.f32.mrf.mxu3 }
 0x122   :  { %v732_v41 = vmax.f32 %v699_v36, 0.0 }
 0x125   :  { %v669_v14 = vpop.f32.mrf.mxu2 }
 0x126   :  { %v670_v12 = vadd.f32 %v669_v14, %v621_v18 }
 0x127   :  { %v700_v38 = vpop.f32.mrf.mxu1 }
 0x128   :  { %v701_v39 = vadd.f32 %v700_v38, %v652_v0  ;;  %v579_v0 = vadd.f32 %v578_v54, %v1707_v57  ;;  %v618_v57 = vadd.f32 %v1832_v48, %v569_v4  ;;  %v719_v33 = vadd.f32 %v718_v32, %v670_v12  ;;  %v847_v32 = vpop.permute.xlu0 %846  ;;  %v1363_v38 = vld [vmem:[%s1906_s3 + $0x38] sm:$0xff] }
 0x12a   :  { %v733_v43 = vmax.f32 %v701_v39, 0.0  ;;  %v667_v10 = vadd.f32 %v666_v30, %v618_v57  ;;  %v740_v26 = vmax.f32 %v719_v33, 0.0  ;;  %v1362_v30 = vld [vmem:[%s1906_s3 + $0x30] sm:$0xff] }
 0x12c   :  { %v746_v13 = vpack.c.bf16 %v733_v43, %v732_v41  ;;  %v716_v37 = vadd.f32 %v715_v23, %v667_v10  ;;  %v1361_v23 = vld [vmem:[%s1906_s3 + $0x28] sm:$0xff]  ;;  %v862_v41 = vpop.permute.xlu2 %861 }
 0x12d   :  { %v671_v49 = vpop.f32.mrf.mxu2 }
 0x12e   :  { %v672_v15 = vadd.f32 %v671_v49, %v623_v44  ;;  %v739_v48 = vmax.f32 %v716_v37, 0.0 }
 0x12f   :  { %v703_v51 = vpop.f32.mrf.mxu1 }
 0x130   :  { %v704_v55 = vadd.f32 %v703_v51, %v655_v47  ;;  %v567_v47 = vadd.f32 %v566_v62, %v1676_v42  ;;  %v721_v50 = vadd.f32 %v720_v27, %v672_v15  ;;  %v842_v14 = vpop.permute.xlu0 %841 }
 0x132   :  { %v734_v2 = vmax.f32 %v704_v55, 0.0  ;;  %v616_v56 = vadd.f32 %v1830_v45, %v567_v47  ;;  %v741_v24 = vmax.f32 %v721_v50, 0.0  ;;  %v1356_v45 = vld [vmem:[%s1906_s3] sm:$0xff] }
 0x134   :  { %v665_v21 = vadd.f32 %v664_v22, %v616_v56  ;;  %v750_v28 = vpack.c.bf16 %v741_v24, %v740_v26  ;;  %v1359_v22 = vld [vmem:[%s1906_s3 + $0x18] sm:$0xff]  ;;  %v837_v46 = vpop.permute.xlu2 %836 }
 0x135   :  { %v674_v58 = vpop.f32.mrf.mxu2 }
 0x136   :  { %v675_v7 = vadd.f32 %v674_v58, %v626_v1 }
 0x137   :  { %v705_v60 = vpop.f32.mrf.mxu1 }
 0x138   :  { %v706_v40 = vadd.f32 %v705_v60, %v657_v52  ;;  %v628_v52 = vadd.f32 %v1824_v5, %v579_v0  ;;  %v724_v61 = vadd.f32 %v723_v53, %v675_v7  ;;  %v714_v5 = vadd.f32 %v1837_v9, %v665_v21  ;;  %v1357_v9 = vld [vmem:[%s1906_s3 + $0x8] sm:$0xff]  ;;  %v817_v43 = vpop.permute.xlu0 %816 }
 0x13a   :  { %v735_v3 = vmax.f32 %v706_v40, 0.0  ;;  %v742_v42 = vmax.f32 %v724_v61, 0.0  ;;  %v738_v31 = vmax.f32 %v714_v5, 0.0 }
 0x13c   :  { %v747_v11 = vpack.c.bf16 %v735_v3, %v734_v2  ;;  %v749_v35 = vpack.c.bf16 %v739_v48, %v738_v31  ;;  %v832_v34 = vpop.permute.xlu2 %831 }
 0x13d   :  { %v676_v8 = vpop.f32.mrf.mxu2 }
 0x13e   :  { %v677_v16 = vadd.f32 %v676_v8, %v628_v52 }
 0x140   :  { %v726_v19 = vadd.f32 %v725_v17, %v677_v16 }
 0x142   :  { %v743_v62 = vmax.f32 %v726_v19, 0.0 }
 0x144   :  { %v751_v25 = vpack.c.bf16 %v743_v62, %v742_v42  ;;  %v807_v0 = vpop.permute.xlu2 %806 }
 0x146   :  { %912 = vmatpush.bf16.msrb.mxu3 %v751_v25 }
 0x14a   :  { %913 = vmatpush.bf16.msrb.mxu3 %v750_v28 }
 0x14c   :  { %v802_v3 = vpop.permute.xlu2 %801 }
 0x14e   :  { %914 = vmatpush.bf16.msrb.mxu3 %v749_v35 }
 0x152   :  { %915 = vmatpush.bf16.msrb.mxu3 %v1839_v20  ;;  %v1358_v20 = vld [vmem:[%s1906_s3 + $0x10] sm:$0xff] }
 0x156   :  { %916 = vmatpush.bf16.msrb.mxu3 %v747_v11 }
 0x15a   :  { %917 = vmatpush.bf16.msrb.mxu3 %v746_v13  ;;  %v812_v13 = vpop.permute.xlu0 %811 }
 0x15e   :  { %918 = vmatpush.bf16.msrb.mxu3 %v1841_v29  ;;  %v857_v29 = vpop.permute.xlu1 %856 }
 0x162   :  { %919 = vmatpush.bf16.msrb.mxu3 %v1835_v6  ;;  %v1360_v6 = vld [vmem:[%s1906_s3 + $0x20] sm:$0xff]  ;;  %v787_v53 = vpop.permute.xlu0 %786 }
 0x165   :  { %920 = vmatmul.bf16.vlgmr.msrb.gmra.mxu3 %v1356_v45 }
 0x166   :  { %v852_v36 = vpop.permute.xlu1 %851 }
 0x16e   :  { %v1883_v39 = vpop.permute.xlu1 %826 }
 0x175   :  { %925 = vmatmul.bf16.gmra.mxu3 %v1357_v9 }
 0x176   :  { %v822_v27 = vpop.permute.xlu1 %821 }
 0x17e   :  { %v797_v49 = vpop.permute.xlu1 %796 }
 0x185   :  { %930 = vmatmul.bf16.gmra.mxu3 %v1358_v20 }
 0x186   :  { %v792_v55 = vpop.permute.xlu1 %791 }
 0x195   :  { %935 = vmatmul.bf16.gmra.mxu3 %v1359_v22 }
 0x1a5   :  { %940 = vmatmul.bf16.gmra.mxu3 %v1360_v6 }
 0x1b5   :  { %945 = vmatmul.bf16.gmra.mxu3 %v1361_v23 }
 0x1c5   :  { %950 = vmatmul.bf16.gmra.mxu3 %v1362_v30 }
 0x1d5   :  { %955 = vmatmul.bf16.gmra.mxu3 %v1363_v38 }
 0x1e8   :  { %v921_v51 = vpop.f32.mrf.mxu3 }
 0x1e9   :  { %v922_v54 = vadd.f32 %v921_v51, %v787_v53 }
 0x1eb   :  { %v961_v60 = vmax.f32 %v922_v54, 0.0  ;;  %v997_v54 = vpop.permute.xlu0 %996 }
 0x1f0   :  { %v923_v58 = vpop.f32.mrf.mxu3 }
 0x1f1   :  { %v924_v59 = vadd.f32 %v923_v58, %v792_v55 }
 0x1f3   :  { %v962_v40 = vmax.f32 %v924_v59, 0.0 }
 0x1f5   :  { %v1885_v63 = vpack.c.bf16 %v962_v40, %v961_v60 }
 0x1f8   :  { %v926_v1 = vpop.f32.mrf.mxu3 }
 0x1f9   :  { %v927_v2 = vadd.f32 %v926_v1, %v797_v49 }
 0x1fb   :  { %v963_v7 = vmax.f32 %v927_v2, 0.0 }
 0x200   :  { %v928_v4 = vpop.f32.mrf.mxu3 }
 0x201   :  { %v929_v44 = vadd.f32 %v928_v4, %v802_v3 }
 0x203   :  { %v964_v11 = vmax.f32 %v929_v44, 0.0 }
 0x205   :  { %v978_v47 = vpack.c.bf16 %v964_v11, %v963_v7 }
 0x208   :  { %v931_v18 = vpop.f32.mrf.mxu3 }
 0x209   :  { %v932_v15 = vadd.f32 %v931_v18, %v807_v0 }
 0x20b   :  { %v965_v57 = vmax.f32 %v932_v15, 0.0 }
 0x210   :  { %v933_v52 = vpop.f32.mrf.mxu3 }
 0x211   :  { %v934_v8 = vadd.f32 %v933_v52, %v812_v13 }
 0x213   :  { %v966_v12 = vmax.f32 %v934_v8, 0.0 }
 0x215   :  { %v979_v61 = vpack.c.bf16 %v966_v12, %v965_v57 }
 0x218   :  { %v936_v16 = vpop.f32.mrf.mxu3 }
 0x219   :  { %v937_v17 = vadd.f32 %v936_v16, %v817_v43 }
 0x21b   :  { %v967_v50 = vmax.f32 %v937_v17, 0.0 }
 0x220   :  { %v938_v56 = vpop.f32.mrf.mxu3 }
 0x221   :  { %v939_v10 = vadd.f32 %v938_v56, %v822_v27 }
 0x223   :  { %v968_v19 = vmax.f32 %v939_v10, 0.0 }
 0x225   :  { %v980_v21 = vpack.c.bf16 %v968_v19, %v967_v50 }
 0x228   :  { %v941_v33 = vpop.f32.mrf.mxu3 }
 0x229   :  { %v942_v13 = vadd.f32 %v941_v33, %v1883_v39 }
 0x230   :  { %v943_v42 = vpop.f32.mrf.mxu3 }
 0x231   :  { %v944_v38 = vadd.f32 %v943_v42, %v832_v34 }
 0x238   :  { %v946_v62 = vpop.f32.mrf.mxu3 }
 0x239   :  { %v947_v23 = vadd.f32 %v946_v62, %v837_v46  ;;  %v992_v46 = vpop.permute.xlu2 %991 }
 0x23b   :  { %v971_v49 = vmax.f32 %v947_v23, 0.0 }
 0x240   :  { %v948_v37 = vpop.f32.mrf.mxu3 }
 0x241   :  { %v949_v20 = vadd.f32 %v948_v37, %v842_v14  ;;  %v1297_v14 = vld [vmem:[%s1907_s5] sm:$0xf] }
 0x243   :  { %v972_v43 = vmax.f32 %v949_v20, 0.0 }
 0x245   :  { %v982_v51 = vpack.c.bf16 %v972_v43, %v971_v49 }
 0x248   :  { %v951_v24 = vpop.f32.mrf.mxu3 }
 0x249   :  { %v952_v35 = vadd.f32 %v951_v24, %v847_v32 }
 0x24b   :  { %v973_v30 = vmax.f32 %v952_v35, 0.0 }
 0x250   :  { %v953_v25 = vpop.f32.mrf.mxu3 }
 0x251   :  { %v954_v28 = vadd.f32 %v953_v25, %v852_v36  ;;  %v969_v36 = vmax.f32 %v942_v13, 0.0 }
 0x253   :  { %v974_v22 = vmax.f32 %v954_v28, 0.0 }
 0x255   :  { %v983_v27 = vpack.c.bf16 %v974_v22, %v973_v30 }
 0x258   :  { %v956_v5 = vpop.f32.mrf.mxu3 }
 0x259   :  { %v957_v26 = vadd.f32 %v956_v5, %v857_v29  ;;  %v970_v29 = vmax.f32 %v944_v38, 0.0 }
 0x25b   :  { %v975_v45 = vmax.f32 %v957_v26, 0.0  ;;  %v981_v32 = vpack.c.bf16 %v970_v29, %v969_v36 }
 0x260   :  { %v958_v48 = vpop.f32.mrf.mxu3 }
 0x261   :  { %v959_v31 = vadd.f32 %v958_v48, %v862_v41  ;;  %v1364_v41 = vld [vmem:[%s1907_s5] sm:$0x10] }
 0x262   :  { %v1298_v39 = vor.u32 %v1364_v41, %v1297_v14 }
 0x263   :  { %v976_v9 = vmax.f32 %v959_v31, 0.0 }
 0x265   :  { %v984_v6 = vpack.c.bf16 %v976_v9, %v975_v45 }
 0x267   :  { %1005 = vmatpush.bf16.msrb.mxu0 %v984_v6 }
 0x26b   :  { %1006 = vmatpush.bf16.msrb.mxu0 %v983_v27 }
 0x26f   :  { %1007 = vmatpush.bf16.msrb.mxu0 %v982_v51 }
 0x273   :  { %1008 = vmatpush.bf16.msrb.mxu0 %v981_v32 }
 0x277   :  { %1009 = vmatpush.bf16.msrb.mxu0 %v980_v21 }
 0x27b   :  { %1010 = vmatpush.bf16.msrb.mxu0 %v979_v61 }
 0x27f   :  { %1011 = vmatpush.bf16.msrb.mxu0 %v978_v47 }
 0x283   :  { %1012 = vmatpush.bf16.msrb.mxu0 %v1885_v63 }
 0x286   :  { %1013 = vmatmul.bf16.vlgmr.msrb.gmra.mxu0 %v1298_v39 }
 0x303   :  { %v1014_v34 = vpop.f32.mrf.mxu0 }
 0x304   :  { %v1015_v53 = vadd.f32 %v1014_v34, %v992_v46 }
 0x306   :  { %1020 = vst.msk [vmem:[%s1908_s7] sm:$0xff] %vm1019_vm1, %v1015_v53 }
 0x30b   :  { %v1016_v55 = vpop.f32.mrf.mxu0 }
 0x30c   :  { %v1017_v58 = vadd.f32 %v1016_v55, %v997_v54 }
 0x30e   :  { %1022 = vst.msk [vmem:[%s1908_s7 + $0x8] sm:$0x3] %vm1021_vm2, %v1017_v58 }

</bundles_post_ra>
